<compile_context>
chip_gen: v7x
topology: tpu7x:2x2x1
jax: 0.10.0
libtpu: 0.0.40
codegen_flags: <defaults>
</compile_context>

<pallas_src>
from functools import partial

import numpy as np
import jax
import jax.numpy as jnp
from jax import lax
from jax.experimental import pallas as pl
from jax.experimental.pallas import tpu as pltpu

_LANE = 128
# activation -> (lrelu alpha, def_gain), matching bias_act.activation_funcs
_ACT_PARAMS = {"lrelu": (0.2, float(np.sqrt(2.0))), "linear": (1.0, 1.0)}


def _round_up(n, m):
    return (n + m - 1) // m * m


def _row_tile(h, target=8):
    t = min(h, target)
    while h % t:
        t -= 1
    return t


# ----------------------------------------------------------------------------
# Fused kernel: affine(w) -> modulate -> lrelu*gain -> 3x3 conv (+bias)
# ----------------------------------------------------------------------------

def _conv3x3_mod_act_kernel(x_ref, wl_ref, aw_ref, ab_ref, w_ref, b_ref, o_ref,
                            *, th, H, W, cin_p, alpha, act_gain, compute_dtype):
    # x_ref : (1, H+2, W+2, cin_p)  zero-padded NHWC input (full image of this batch)
    # wl_ref: (1, 1, w_dim)         latent for this batch
    # aw_ref: (w_dim, 2*cin_p)      [gamma | beta] affine weights (already * 1/sqrt(w_dim))
    # ab_ref: (1, 2*cin_p)          [gamma | beta] affine biases
    # w_ref : (9, cin_p, tn)        conv weights (ky*3+kx, cin, cout-tile), compute_dtype
    # b_ref : (1, tn)               conv bias tile (already * bias_gain * gain)
    # o_ref : (1, th, W, tn)
    i = pl.program_id(1)
    row0 = pl.multiple_of(i * th, th)          # top padded-row of this tile's halo window

    # ---- affine from the latent: gamma / beta (tiny, recomputed per tile) --------------
    gb = jnp.dot(wl_ref[0], aw_ref[...], preferred_element_type=jnp.float32) + ab_ref[...]
    gamma = gb[:, :cin_p].reshape(1, 1, cin_p)
    beta = gb[:, cin_p:].reshape(1, 1, cin_p)

    # ---- modulation + lrelu*gain on the (th+2, W+2, cin_p) halo window (f32 VPU) -------
    xw = x_ref[0, pl.ds(row0, th + 2), :, :]
    y = xw * gamma + beta
    y = jnp.where(y >= 0.0, y, alpha * y) * act_gain

    # The reference applies conv zero-padding AFTER modulation/activation, so re-zero the
    # positions of this window that belong to the padding ring of the image.
    rows = lax.broadcasted_iota(jnp.int32, y.shape, 0) + row0
    cols = lax.broadcasted_iota(jnp.int32, y.shape, 1)
    valid = (rows >= 1) & (rows <= H) & (cols >= 1) & (cols <= W)
    y = jnp.where(valid, y, 0.0).astype(compute_dtype)

    # ---- 3x3 conv = 9 accumulating MXU matmuls over shifted windows --------------------
    tn = o_ref.shape[-1]
    acc = jnp.zeros((th * W, tn), jnp.float32)
    for t in range(9):
        dy, dx = divmod(t, 3)
        win = y[dy:dy + th, dx:dx + W, :].reshape(th * W, cin_p)
        acc = acc + jnp.dot(win, w_ref[t], preferred_element_type=jnp.float32)
    acc = acc + b_ref[...]
    o_ref[0] = acc.reshape(th, W, tn).astype(o_ref.dtype)


def _conv2d_pallas(x_pad, wl, aff_w, aff_b, w9, bias2, *, H, W, th, tn,
                   alpha, act_gain, compute_dtype,
                   vmem_limit_bytes=32 * 1024 * 1024):
    B, Hp2, Wp2, cin_p = x_pad.shape
    cout_p = w9.shape[-1]
    wd = wl.shape[-1]
    grid = (B, H // th, cout_p // tn)

    kern = partial(_conv3x3_mod_act_kernel, th=th, H=H, W=W, cin_p=cin_p,
                   alpha=alpha, act_gain=act_gain, compute_dtype=compute_dtype)

    cost = pl.CostEstimate(
        flops=int(2 * B * H * W * cout_p * 9 * cin_p),
        transcendentals=0,
        bytes_accessed=int(x_pad.size * x_pad.dtype.itemsize
                           + w9.size * w9.dtype.itemsize
                           + B * H * W * cout_p * 4))

    return pl.pallas_call(
        kern,
        out_shape=jax.ShapeDtypeStruct((B, H, W, cout_p), jnp.float32),
        grid_spec=pltpu.PrefetchScalarGridSpec(
            num_scalar_prefetch=0,
            grid=grid,
            in_specs=[
                pl.BlockSpec((1, Hp2, Wp2, cin_p), lambda b, i, j: (b, 0, 0, 0)),
                pl.BlockSpec((1, 1, wd), lambda b, i, j: (b, 0, 0)),
                pl.BlockSpec((wd, 2 * cin_p), lambda b, i, j: (0, 0)),
                pl.BlockSpec((1, 2 * cin_p), lambda b, i, j: (0, 0)),
                pl.BlockSpec((9, cin_p, tn), lambda b, i, j: (0, 0, j)),
                pl.BlockSpec((1, tn), lambda b, i, j: (0, j)),
            ],
            out_specs=pl.BlockSpec((1, th, W, tn), lambda b, i, j: (b, i, 0, j)),
        ),
        compiler_params=pltpu.CompilerParams(
            dimension_semantics=("parallel", "parallel", "parallel"),
            vmem_limit_bytes=vmem_limit_bytes),
        cost_estimate=cost,
    )(x_pad, wl, aff_w, aff_b, w9, bias2)


# ----------------------------------------------------------------------------
# Module wrapper (parameter init mirrors the PyTorch module; prep done once)
# ----------------------------------------------------------------------------

class Conv2dPallas:
    """Pallas TPU equivalent of triagan's Conv2d (norm=None, use_noise=False, s=None)."""

    def __init__(self, in_channels, out_channels, kernel_size=3, activation="lrelu",
                 bias=True, lr_multiplier=1, bias_init=0, w_dim=None, gain=1,
                 padding=None, key=None, compute_dtype=jnp.bfloat16):
        assert kernel_size == 3, "TODO(synk): only kernel_size=3 implemented"
        pad = kernel_size // 2 if padding is None else padding
        assert pad == kernel_size // 2, "TODO(synk): only 'same' padding implemented"
        assert activation in _ACT_PARAMS, "TODO(synk): only lrelu/linear implemented"

        key = jax.random.PRNGKey(0) if key is None else key
        k_w, k_g, k_b = jax.random.split(key, 3)

        self.in_channels = in_channels
        self.out_channels = out_channels
        self.w_dim = w_dim
        self.alpha, self.act_gain = _ACT_PARAMS[activation]
        self.compute_dtype = compute_dtype

        weight = jax.random.normal(k_w, (out_channels, in_channels, 3, 3), jnp.float32)
        bias_v = (jnp.full((out_channels,), float(bias_init), jnp.float32)
                  if bias else jnp.zeros((out_channels,), jnp.float32))
        weight_gain = lr_multiplier / np.sqrt(in_channels * kernel_size ** 2)
        bias_gain = float(lr_multiplier)

        cin_p = _round_up(in_channels, _LANE)
        cout_p = _round_up(out_channels, _LANE)
        self.cin_p, self.cout_p = cin_p, cout_p

        # ---- one-time parameter prep: scale, NHWC tap layout, lane padding, bf16 -------
        w_k = jnp.transpose(weight * (weight_gain * gain), (2, 3, 1, 0))   # (ky,kx,ci,co)
        w_k = jnp.pad(w_k, ((0, 0), (0, 0),
                            (0, cin_p - in_channels), (0, cout_p - out_channels)))
        self.w9 = w_k.reshape(9, cin_p, cout_p).astype(compute_dtype)
        self.bias2 = jnp.pad(bias_v * (bias_gain * gain),
                             (0, cout_p - out_channels)).reshape(1, cout_p)

        # affine layers: FullyConnectedLayer(w_dim, in_channels, bias_init=1 / 0), lr=1
        if w_dim is not None:
            aff_g_w = jax.random.normal(k_g, (in_channels, w_dim), jnp.float32)
            aff_b_w = jax.random.normal(k_b, (in_channels, w_dim), jnp.float32)
            fc_gain = 1.0 / np.sqrt(w_dim)
            Ag, Ab = (aff_g_w * fc_gain).T, (aff_b_w * fc_gain).T          # (w_dim, C)
            bg = jnp.ones((in_channels,), jnp.float32)
            bb = jnp.zeros((in_channels,), jnp.float32)
            self._wd_eff = w_dim
        else:
            # no affine -> identity modulation (gamma = 1, beta = 0)
            aff_g_w = aff_b_w = None
            fc_gain = 1.0
            Ag = jnp.zeros((1, in_channels), jnp.float32)
            Ab = jnp.zeros((1, in_channels), jnp.float32)
            bg = jnp.ones((in_channels,), jnp.float32)
            bb = jnp.zeros((in_channels,), jnp.float32)
            self._wd_eff = 1
        pad_c = (0, cin_p - in_channels)
        self.aff_w = jnp.concatenate(
            [jnp.pad(Ag, ((0, 0), pad_c)), jnp.pad(Ab, ((0, 0), pad_c))], axis=1)
        self.aff_b = jnp.concatenate(
            [jnp.pad(bg, pad_c), jnp.pad(bb, pad_c)]).reshape(1, 2 * cin_p)

        # raw params for the pure-JAX reference check
        self._raw = dict(weight=weight, bias=bias_v, aff_g_w=aff_g_w, aff_b_w=aff_b_w,
                         weight_gain=float(weight_gain), bias_gain=bias_gain,
                         gain=float(gain), fc_gain=float(fc_gain))

    def __call__(self, x_nchw, w=None, s=None):
        assert s is None, "TODO(synk): s-iterator modulation branch not implemented"
        B, C, H, W_ = x_nchw.shape
        assert C == self.in_channels

        # layout: public API is NCHW (PyTorch); the kernel runs NHWC, channels on lanes
        x = jnp.transpose(x_nchw, (0, 2, 3, 1)).astype(jnp.float32)
        x = jnp.pad(x, ((0, 0), (1, 1), (1, 1), (0, self.cin_p - C)))   # halo + lane pad

        if self.w_dim is not None:
            assert w is not None
            wl = w.reshape(B, 1, self.w_dim).astype(jnp.float32)
        else:
            wl = jnp.zeros((B, 1, self._wd_eff), jnp.float32)

        out = _conv2d_pallas(x, wl, self.aff_w, self.aff_b, self.w9, self.bias2,
                             H=H, W=W_, th=_row_tile(H), tn=min(_LANE, self.cout_p),
                             alpha=self.alpha, act_gain=self.act_gain,
                             compute_dtype=self.compute_dtype)
        out = out[..., :self.out_channels]
        return jnp.transpose(out, (0, 3, 1, 2))                         # back to NCHW


# ----------------------------------------------------------------------------
# Pure-JAX (XLA) reference, mirroring the PyTorch forward, for correctness check
# ----------------------------------------------------------------------------

def reference_forward(m: Conv2dPallas, x_nchw, w_latent):
    r = m._raw
    x = x_nchw.astype(jnp.float32)
    if m.w_dim is not None:
        gamma = w_latent @ (r["aff_g_w"] * r["fc_gain"]).T + 1.0
        beta = w_latent @ (r["aff_b_w"] * r["fc_gain"]).T
        x = x * gamma[:, :, None, None] + beta[:, :, None, None]
    x = jnp.where(x >= 0.0, x, m.alpha * x) * m.act_gain
    w = r["weight"] * (r["weight_gain"] * r["gain"])
    b = r["bias"] * (r["bias_gain"] * r["gain"])
    y = lax.conv_general_dilated(x, w, window_strides=(1, 1),
                                 padding=((1, 1), (1, 1)),
                                 dimension_numbers=("NCHW", "OIHW", "NCHW"))
    return y + b[None, :, None, None]


# ----------------------------------------------------------------------------

if __name__ == "__main__":
    key = jax.random.PRNGKey(0)
    kx, kw, kp = jax.random.split(key, 3)

    B, C_IN, C_OUT, H, W, W_DIM = 2, 4, 8, 16, 16, 32

    x = jax.random.normal(kx, (B, C_IN, H, W), jnp.float32)      # NCHW, like PyTorch
    w_latent = jax.random.normal(kw, (B, W_DIM), jnp.float32)

    conv = Conv2dPallas(C_IN, C_OUT, kernel_size=3, activation="lrelu",
                        w_dim=W_DIM, key=kp)

    out = conv(x, w_latent, s=None)
    out = jax.block_until_ready(out)
    assert out.shape == (B, C_OUT, H, W)

    ref = jax.block_until_ready(reference_forward(conv, x, w_latent))
    rel_err = float(jnp.max(jnp.abs(out - ref)) / (jnp.max(jnp.abs(ref)) + 1e-6))
    assert rel_err < 5e-2, f"mismatch vs reference: rel err {rel_err:.3e}"

    print("KERNEL_OK")
</pallas_src>

<mosaic_0001>
module attributes {stable_mosaic.version = 11 : i64} {
  func.func @_conv3x3_mod_act_kernel(%arg0: i32, %arg1: i32, %arg2: i32, %arg3: memref<1x18x18x128xf32, #tpu.memory_space<vmem>>, %arg4: memref<1x1x32xf32, #tpu.memory_space<vmem>>, %arg5: memref<32x256xf32, #tpu.memory_space<vmem>>, %arg6: memref<1x256xf32, #tpu.memory_space<vmem>>, %arg7: memref<9x128x128xbf16, #tpu.memory_space<vmem>>, %arg8: memref<1x128xf32, #tpu.memory_space<vmem>>, %arg9: memref<1x8x16x128xf32, #tpu.memory_space<vmem>>) attributes {dimension_semantics = [#tpu.dimension_semantics<parallel>, #tpu.dimension_semantics<parallel>, #tpu.dimension_semantics<parallel>], iteration_bounds = array<i64: 2, 2, 1>, scalar_prefetch = 0 : i64, scratch_operands = 0 : i64, tpu.core_type = #tpu.core_type<tc>, window_params = [{transform_indices = @transform_0, window_bounds = array<i64: 1, 18, 18, 128>}, {transform_indices = @transform_1, window_bounds = array<i64: 1, 1, 32>}, {pipeline_mode = #tpu.pipeline_mode<synchronous>, transform_indices = @transform_2, window_bounds = array<i64: 32, 256>}, {pipeline_mode = #tpu.pipeline_mode<synchronous>, transform_indices = @transform_3, window_bounds = array<i64: 1, 256>}, {transform_indices = @transform_4, window_bounds = array<i64: 9, 128, 128>}, {transform_indices = @transform_5, window_bounds = array<i64: 1, 128>}, {transform_indices = @transform_6, window_bounds = array<i64: 1, 8, 16, 128>}]} {
    %c8_i32 = arith.constant 8 : i32
    %0 = arith.muli %arg1, %c8_i32 : i32
    %1 = tpu.assume_multiple %0, 8 : i32
    %c0 = arith.constant 0 : index
    %c0_0 = arith.constant 0 : index
    %c0_1 = arith.constant 0 : index
    %2 = vector.load %arg4[%c0, %c0_0, %c0_1] : memref<1x1x32xf32, #tpu.memory_space<vmem>>, vector<1x1x32xf32>
    %3 = vector.shape_cast %2 : vector<1x1x32xf32> to vector<1x32xf32>
    %c0_2 = arith.constant 0 : index
    %c0_3 = arith.constant 0 : index
    %4 = vector.load %arg5[%c0_2, %c0_3] : memref<32x256xf32, #tpu.memory_space<vmem>>, vector<32x256xf32>
    %cst = arith.constant dense<0.000000e+00> : vector<1x256xf32>
    %5 = tpu.matmul %3, %4, %cst {dimension_numbers = #tpu.dot_dimension_numbers<[1], [0], [0], [1], [0, 0, 1, 1], [], []>} : vector<1x32xf32>, vector<32x256xf32>, vector<1x256xf32> -> vector<1x256xf32>
    %c0_4 = arith.constant 0 : index
    %c0_5 = arith.constant 0 : index
    %6 = vector.load %arg6[%c0_4, %c0_5] : memref<1x256xf32, #tpu.memory_space<vmem>>, vector<1x256xf32>
    %7 = arith.addf %5, %6 : vector<1x256xf32>
    %8 = vector.extract_strided_slice %7 {offsets = [0, 0], sizes = [1, 128], strides = [1, 1]} : vector<1x256xf32> to vector<1x128xf32>
    %9 = vector.shape_cast %8 : vector<1x128xf32> to vector<1x1x128xf32>
    %10 = vector.extract_strided_slice %7 {offsets = [0, 128], sizes = [1, 128], strides = [1, 1]} : vector<1x256xf32> to vector<1x128xf32>
    %11 = vector.shape_cast %10 : vector<1x128xf32> to vector<1x1x128xf32>
    %c0_6 = arith.constant 0 : index
    %12 = arith.index_cast %1 : i32 to index
    %c0_7 = arith.constant 0 : index
    %c0_8 = arith.constant 0 : index
    %13 = vector.load %arg3[%c0_6, %12, %c0_7, %c0_8] : memref<1x18x18x128xf32, #tpu.memory_space<vmem>>, vector<1x10x18x128xf32>
    %14 = vector.shape_cast %13 : vector<1x10x18x128xf32> to vector<10x18x128xf32>
    %15 = vector.broadcast %9 : vector<1x1x128xf32> to vector<10x18x128xf32>
    %16 = arith.mulf %14, %15 : vector<10x18x128xf32>
    %17 = vector.broadcast %11 : vector<1x1x128xf32> to vector<10x18x128xf32>
    %18 = arith.addf %16, %17 : vector<10x18x128xf32>
    %cst_9 = arith.constant 0.000000e+00 : f32
    %19 = vector.broadcast %cst_9 : f32 to vector<10x18x128xf32>
    %20 = arith.cmpf oge, %18, %19 : vector<10x18x128xf32>
    %cst_10 = arith.constant 2.000000e-01 : f32
    %21 = vector.broadcast %cst_10 : f32 to vector<10x18x128xf32>
    %22 = arith.mulf %21, %18 : vector<10x18x128xf32>
    %23 = arith.select %20, %18, %22 : vector<10x18x128xi1>, vector<10x18x128xf32>
    %cst_11 = arith.constant 1.41421354 : f32
    %24 = vector.broadcast %cst_11 : f32 to vector<10x18x128xf32>
    %25 = arith.mulf %23, %24 : vector<10x18x128xf32>
    %26 = tpu.iota {dimensions = array<i32: 0>} : vector<10x18x128xi32>
    %27 = vector.broadcast %1 : i32 to vector<10x18x128xi32>
    %28 = arith.addi %26, %27 : vector<10x18x128xi32>
    %29 = tpu.iota {dimensions = array<i32: 1>} : vector<10x18x128xi32>
    %c1_i32 = arith.constant 1 : i32
    %30 = vector.broadcast %c1_i32 : i32 to vector<10x18x128xi32>
    %31 = arith.cmpi sge, %28, %30 : vector<10x18x128xi32>
    %c16_i32 = arith.constant 16 : i32
    %32 = vector.broadcast %c16_i32 : i32 to vector<10x18x128xi32>
    %33 = arith.cmpi sle, %28, %32 : vector<10x18x128xi32>
    %34 = arith.andi %31, %33 : vector<10x18x128xi1>
    %c1_i32_12 = arith.constant 1 : i32
    %35 = vector.broadcast %c1_i32_12 : i32 to vector<10x18x128xi32>
    %36 = arith.cmpi sge, %29, %35 : vector<10x18x128xi32>
    %37 = arith.andi %34, %36 : vector<10x18x128xi1>
    %c16_i32_13 = arith.constant 16 : i32
    %38 = vector.broadcast %c16_i32_13 : i32 to vector<10x18x128xi32>
    %39 = arith.cmpi sle, %29, %38 : vector<10x18x128xi32>
    %40 = arith.andi %37, %39 : vector<10x18x128xi1>
    %cst_14 = arith.constant 0.000000e+00 : f32
    %41 = vector.broadcast %cst_14 : f32 to vector<10x18x128xf32>
    %42 = arith.select %40, %25, %41 : vector<10x18x128xi1>, vector<10x18x128xf32>
    %43 = arith.truncf %42 : vector<10x18x128xf32> to vector<10x18x128xbf16>
    %cst_15 = arith.constant 0.000000e+00 : f32
    %44 = vector.broadcast %cst_15 : f32 to vector<128x128xf32>
    %45 = vector.extract_strided_slice %43 {offsets = [0, 0, 0], sizes = [8, 16, 128], strides = [1, 1, 1]} : vector<10x18x128xbf16> to vector<8x16x128xbf16>
    %46 = vector.shape_cast %45 : vector<8x16x128xbf16> to vector<128x128xbf16>
    %c0_16 = arith.constant 0 : index
    %c0_17 = arith.constant 0 : index
    %c0_18 = arith.constant 0 : index
    %47 = vector.load %arg7[%c0_16, %c0_17, %c0_18] : memref<9x128x128xbf16, #tpu.memory_space<vmem>>, vector<1x128x128xbf16>
    %48 = vector.shape_cast %47 : vector<1x128x128xbf16> to vector<128x128xbf16>
    %cst_19 = arith.constant dense<0.000000e+00> : vector<128x128xf32>
    %49 = tpu.matmul %46, %48, %cst_19 {dimension_numbers = #tpu.dot_dimension_numbers<[1], [0], [0], [1], [0, 0, 1, 1], [], []>} : vector<128x128xbf16>, vector<128x128xbf16>, vector<128x128xf32> -> vector<128x128xf32>
    %50 = arith.addf %44, %49 : vector<128x128xf32>
    %51 = vector.extract_strided_slice %43 {offsets = [0, 1, 0], sizes = [8, 16, 128], strides = [1, 1, 1]} : vector<10x18x128xbf16> to vector<8x16x128xbf16>
    %52 = vector.shape_cast %51 : vector<8x16x128xbf16> to vector<128x128xbf16>
    %c1 = arith.constant 1 : index
    %c0_20 = arith.constant 0 : index
    %c0_21 = arith.constant 0 : index
    %53 = vector.load %arg7[%c1, %c0_20, %c0_21] : memref<9x128x128xbf16, #tpu.memory_space<vmem>>, vector<1x128x128xbf16>
    %54 = vector.shape_cast %53 : vector<1x128x128xbf16> to vector<128x128xbf16>
    %cst_22 = arith.constant dense<0.000000e+00> : vector<128x128xf32>
    %55 = tpu.matmul %52, %54, %cst_22 {dimension_numbers = #tpu.dot_dimension_numbers<[1], [0], [0], [1], [0, 0, 1, 1], [], []>} : vector<128x128xbf16>, vector<128x128xbf16>, vector<128x128xf32> -> vector<128x128xf32>
    %56 = arith.addf %50, %55 : vector<128x128xf32>
    %57 = vector.extract_strided_slice %43 {offsets = [0, 2, 0], sizes = [8, 16, 128], strides = [1, 1, 1]} : vector<10x18x128xbf16> to vector<8x16x128xbf16>
    %58 = vector.shape_cast %57 : vector<8x16x128xbf16> to vector<128x128xbf16>
    %c2 = arith.constant 2 : index
    %c0_23 = arith.constant 0 : index
    %c0_24 = arith.constant 0 : index
    %59 = vector.load %arg7[%c2, %c0_23, %c0_24] : memref<9x128x128xbf16, #tpu.memory_space<vmem>>, vector<1x128x128xbf16>
    %60 = vector.shape_cast %59 : vector<1x128x128xbf16> to vector<128x128xbf16>
    %cst_25 = arith.constant dense<0.000000e+00> : vector<128x128xf32>
    %61 = tpu.matmul %58, %60, %cst_25 {dimension_numbers = #tpu.dot_dimension_numbers<[1], [0], [0], [1], [0, 0, 1, 1], [], []>} : vector<128x128xbf16>, vector<128x128xbf16>, vector<128x128xf32> -> vector<128x128xf32>
    %62 = arith.addf %56, %61 : vector<128x128xf32>
    %63 = vector.extract_strided_slice %43 {offsets = [1, 0, 0], sizes = [8, 16, 128], strides = [1, 1, 1]} : vector<10x18x128xbf16> to vector<8x16x128xbf16>
    %64 = vector.shape_cast %63 : vector<8x16x128xbf16> to vector<128x128xbf16>
    %c3 = arith.constant 3 : index
    %c0_26 = arith.constant 0 : index
    %c0_27 = arith.constant 0 : index
    %65 = vector.load %arg7[%c3, %c0_26, %c0_27] : memref<9x128x128xbf16, #tpu.memory_space<vmem>>, vector<1x128x128xbf16>
    %66 = vector.shape_cast %65 : vector<1x128x128xbf16> to vector<128x128xbf16>
    %cst_28 = arith.constant dense<0.000000e+00> : vector<128x128xf32>
    %67 = tpu.matmul %64, %66, %cst_28 {dimension_numbers = #tpu.dot_dimension_numbers<[1], [0], [0], [1], [0, 0, 1, 1], [], []>} : vector<128x128xbf16>, vector<128x128xbf16>, vector<128x128xf32> -> vector<128x128xf32>
    %68 = arith.addf %62, %67 : vector<128x128xf32>
    %69 = vector.extract_strided_slice %43 {offsets = [1, 1, 0], sizes = [8, 16, 128], strides = [1, 1, 1]} : vector<10x18x128xbf16> to vector<8x16x128xbf16>
    %70 = vector.shape_cast %69 : vector<8x16x128xbf16> to vector<128x128xbf16>
    %c4 = arith.constant 4 : index
    %c0_29 = arith.constant 0 : index
    %c0_30 = arith.constant 0 : index
    %71 = vector.load %arg7[%c4, %c0_29, %c0_30] : memref<9x128x128xbf16, #tpu.memory_space<vmem>>, vector<1x128x128xbf16>
    %72 = vector.shape_cast %71 : vector<1x128x128xbf16> to vector<128x128xbf16>
    %cst_31 = arith.constant dense<0.000000e+00> : vector<128x128xf32>
    %73 = tpu.matmul %70, %72, %cst_31 {dimension_numbers = #tpu.dot_dimension_numbers<[1], [0], [0], [1], [0, 0, 1, 1], [], []>} : vector<128x128xbf16>, vector<128x128xbf16>, vector<128x128xf32> -> vector<128x128xf32>
    %74 = arith.addf %68, %73 : vector<128x128xf32>
    %75 = vector.extract_strided_slice %43 {offsets = [1, 2, 0], sizes = [8, 16, 128], strides = [1, 1, 1]} : vector<10x18x128xbf16> to vector<8x16x128xbf16>
    %76 = vector.shape_cast %75 : vector<8x16x128xbf16> to vector<128x128xbf16>
    %c5 = arith.constant 5 : index
    %c0_32 = arith.constant 0 : index
    %c0_33 = arith.constant 0 : index
    %77 = vector.load %arg7[%c5, %c0_32, %c0_33] : memref<9x128x128xbf16, #tpu.memory_space<vmem>>, vector<1x128x128xbf16>
    %78 = vector.shape_cast %77 : vector<1x128x128xbf16> to vector<128x128xbf16>
    %cst_34 = arith.constant dense<0.000000e+00> : vector<128x128xf32>
    %79 = tpu.matmul %76, %78, %cst_34 {dimension_numbers = #tpu.dot_dimension_numbers<[1], [0], [0], [1], [0, 0, 1, 1], [], []>} : vector<128x128xbf16>, vector<128x128xbf16>, vector<128x128xf32> -> vector<128x128xf32>
    %80 = arith.addf %74, %79 : vector<128x128xf32>
    %81 = vector.extract_strided_slice %43 {offsets = [2, 0, 0], sizes = [8, 16, 128], strides = [1, 1, 1]} : vector<10x18x128xbf16> to vector<8x16x128xbf16>
    %82 = vector.shape_cast %81 : vector<8x16x128xbf16> to vector<128x128xbf16>
    %c6 = arith.constant 6 : index
    %c0_35 = arith.constant 0 : index
    %c0_36 = arith.constant 0 : index
    %83 = vector.load %arg7[%c6, %c0_35, %c0_36] : memref<9x128x128xbf16, #tpu.memory_space<vmem>>, vector<1x128x128xbf16>
    %84 = vector.shape_cast %83 : vector<1x128x128xbf16> to vector<128x128xbf16>
    %cst_37 = arith.constant dense<0.000000e+00> : vector<128x128xf32>
    %85 = tpu.matmul %82, %84, %cst_37 {dimension_numbers = #tpu.dot_dimension_numbers<[1], [0], [0], [1], [0, 0, 1, 1], [], []>} : vector<128x128xbf16>, vector<128x128xbf16>, vector<128x128xf32> -> vector<128x128xf32>
    %86 = arith.addf %80, %85 : vector<128x128xf32>
    %87 = vector.extract_strided_slice %43 {offsets = [2, 1, 0], sizes = [8, 16, 128], strides = [1, 1, 1]} : vector<10x18x128xbf16> to vector<8x16x128xbf16>
    %88 = vector.shape_cast %87 : vector<8x16x128xbf16> to vector<128x128xbf16>
    %c7 = arith.constant 7 : index
    %c0_38 = arith.constant 0 : index
    %c0_39 = arith.constant 0 : index
    %89 = vector.load %arg7[%c7, %c0_38, %c0_39] : memref<9x128x128xbf16, #tpu.memory_space<vmem>>, vector<1x128x128xbf16>
    %90 = vector.shape_cast %89 : vector<1x128x128xbf16> to vector<128x128xbf16>
    %cst_40 = arith.constant dense<0.000000e+00> : vector<128x128xf32>
    %91 = tpu.matmul %88, %90, %cst_40 {dimension_numbers = #tpu.dot_dimension_numbers<[1], [0], [0], [1], [0, 0, 1, 1], [], []>} : vector<128x128xbf16>, vector<128x128xbf16>, vector<128x128xf32> -> vector<128x128xf32>
    %92 = arith.addf %86, %91 : vector<128x128xf32>
    %93 = vector.extract_strided_slice %43 {offsets = [2, 2, 0], sizes = [8, 16, 128], strides = [1, 1, 1]} : vector<10x18x128xbf16> to vector<8x16x128xbf16>
    %94 = vector.shape_cast %93 : vector<8x16x128xbf16> to vector<128x128xbf16>
    %c8 = arith.constant 8 : index
    %c0_41 = arith.constant 0 : index
    %c0_42 = arith.constant 0 : index
    %95 = vector.load %arg7[%c8, %c0_41, %c0_42] : memref<9x128x128xbf16, #tpu.memory_space<vmem>>, vector<1x128x128xbf16>
    %96 = vector.shape_cast %95 : vector<1x128x128xbf16> to vector<128x128xbf16>
    %cst_43 = arith.constant dense<0.000000e+00> : vector<128x128xf32>
    %97 = tpu.matmul %94, %96, %cst_43 {dimension_numbers = #tpu.dot_dimension_numbers<[1], [0], [0], [1], [0, 0, 1, 1], [], []>} : vector<128x128xbf16>, vector<128x128xbf16>, vector<128x128xf32> -> vector<128x128xf32>
    %98 = arith.addf %92, %97 : vector<128x128xf32>
    %c0_44 = arith.constant 0 : index
    %c0_45 = arith.constant 0 : index
    %99 = vector.load %arg8[%c0_44, %c0_45] : memref<1x128xf32, #tpu.memory_space<vmem>>, vector<1x128xf32>
    %100 = vector.broadcast %99 : vector<1x128xf32> to vector<128x128xf32>
    %101 = arith.addf %98, %100 : vector<128x128xf32>
    %102 = vector.shape_cast %101 : vector<128x128xf32> to vector<8x16x128xf32>
    %c0_46 = arith.constant 0 : index
    %c0_47 = arith.constant 0 : index
    %c0_48 = arith.constant 0 : index
    %c0_49 = arith.constant 0 : index
    %103 = vector.load %arg9[%c0_46, %c0_47, %c0_48, %c0_49] : memref<1x8x16x128xf32, #tpu.memory_space<vmem>>, vector<1x8x16x128xf32>
    %104 = vector.shape_cast %103 : vector<1x8x16x128xf32> to vector<8x16x128xf32>
    %105 = vector.shape_cast %102 : vector<8x16x128xf32> to vector<1x8x16x128xf32>
    tpu.vector_store %arg9[%c0_46, %c0_47, %c0_48, %c0_49], %105 {strides = array<i32>} : memref<1x8x16x128xf32, #tpu.memory_space<vmem>>, vector<1x8x16x128xf32>,
    return
  }
  func.func @transform_0(%arg0: i32, %arg1: i32, %arg2: i32) -> (i32, i32, i32, i32) {
    %c0_i32 = arith.constant 0 : i32
    %c0_i32_0 = arith.constant 0 : i32
    %c0_i32_1 = arith.constant 0 : i32
    %c0_i32_2 = arith.constant 0 : i32
    return %arg0, %c0_i32, %c0_i32_0, %c0_i32_1 : i32, i32, i32, i32
  }
  func.func @transform_1(%arg0: i32, %arg1: i32, %arg2: i32) -> (i32, i32, i32) {
    %c0_i32 = arith.constant 0 : i32
    %c0_i32_0 = arith.constant 0 : i32
    %c0_i32_1 = arith.constant 0 : i32
    return %arg0, %c0_i32, %c0_i32_0 : i32, i32, i32
  }
  func.func @transform_2(%arg0: i32, %arg1: i32, %arg2: i32) -> (i32, i32) {
    %c0_i32 = arith.constant 0 : i32
    %c0_i32_0 = arith.constant 0 : i32
    %c0_i32_1 = arith.constant 0 : i32
    return %c0_i32, %c0_i32_0 : i32, i32
  }
  func.func @transform_3(%arg0: i32, %arg1: i32, %arg2: i32) -> (i32, i32) {
    %c0_i32 = arith.constant 0 : i32
    %c0_i32_0 = arith.constant 0 : i32
    %c0_i32_1 = arith.constant 0 : i32
    return %c0_i32, %c0_i32_0 : i32, i32
  }
  func.func @transform_4(%arg0: i32, %arg1: i32, %arg2: i32) -> (i32, i32, i32) {
    %c0_i32 = arith.constant 0 : i32
    %c0_i32_0 = arith.constant 0 : i32
    %c0_i32_1 = arith.constant 0 : i32
    return %c0_i32, %c0_i32_0, %arg2 : i32, i32, i32
  }
  func.func @transform_5(%arg0: i32, %arg1: i32, %arg2: i32) -> (i32, i32) {
    %c0_i32 = arith.constant 0 : i32
    %c0_i32_0 = arith.constant 0 : i32
    return %c0_i32, %arg2 : i32, i32
  }
  func.func @transform_6(%arg0: i32, %arg1: i32, %arg2: i32) -> (i32, i32, i32, i32) {
    %c0_i32 = arith.constant 0 : i32
    %c0_i32_0 = arith.constant 0 : i32
    return %arg0, %arg1, %c0_i32, %arg2 : i32, i32, i32, i32
  }
}

</mosaic_0001>

<bundles_post_ra>
// kernel: tpu_custom_call.1
= control target key start
LH: loop header
LB: loop body
LE: loop exit
PB: predicated region body
PF: predicated region fallthrough
CT: control target
= control target key end

     0   :  { %11 = vsyncpa [#allocation3], 0  ;;  %s5146_s0 = inlined_call_operand.vmem [shape: f32[2,18,18,128], index: 0, kind: input, shape index: {}]   ;;  %s5147_s1 = inlined_call_operand.vmem [shape: f32[2,1,32], index: 1, kind: input, shape index: {}]   ;;  %s5148_s2 = inlined_call_operand.vmem [shape: f32[32,256], index: 2, kind: input, shape index: {}]   ;;  %s5149_s3 = inlined_call_operand.vmem [shape: f32[1,256], index: 3, kind: input, shape index: {}]   ;;  %s5150_s4 = inlined_call_operand.vmem [shape: bf16[9,128,128], index: 4, kind: input, shape index: {}]   ;;  %s5151_s5 = inlined_call_operand.vmem [shape: f32[1,128], index: 5, kind: input, shape index: {}]   ;;  %s5152_s6 = inlined_call_operand.hbm [shape: f32[2,16,16,128], index: 6, kind: output, shape index: {}]  }
   0x1   :  { %13 = vsyncpa [#allocation3 + $0x1], 0  ;;  %s3892_s21 = smov 0   ;;  %s3894_s22 = smov 0  }
   0x2   :  { %s3896_s23 = smov 0   ;;  %s3898_s24 = smov 0  }
   0x3   :  { %s3900_s25 = smov 0   ;;  %s3902_s26 = smov 0  }
   0x4   :  { %s3904_s27 = smov 0   ;;  %s3906_s28 = smov 0  }
   0x5 LB: > { %s2733_s29 = sadd.s32 4294967295, %s3851_s28   ;;  %s2734_s30 = sadd.s32 4294967294, %s3851_s28   ;;  %s3851_s28 = sphi %s3906_s28, %s19_s28   ;;  %s3847_s27 = sphi %s3904_s27, %s5306_s27   ;;  %s3843_s26 = sphi %s3902_s26, %s5305_s26   ;;  %s3839_s25 = sphi %s3900_s25, %s5304_s25   ;;  %s3835_s24 = sphi %s3898_s24, %s5303_s24   ;;  %s3831_s23 = sphi %s3896_s23, %s5302_s23   ;;  %s3827_s22 = sphi %s3894_s22, %s5301_s22   ;;  %s3823_s21 = sphi %s3892_s21, %s5300_s21  }
   0x6   : > { %s34_s7 = sadd.s32 1, %s3843_s26  ;;  %s38_s8 = sadd.s32 1, %s3847_s27 }
   0x7   : > { %p36_p0 = scmp.ge.s32.totalorder %s34_s7, 2  ;;  %p205_p1 = scmp.ne.s32.totalorder %s3831_s23, %s3827_s22 }
   0x8   : > { %p206_p2 = scmp.eq.s32.totalorder %s2733_s29, 3  ;;  %p211_p5 = scmp.ne.s32.totalorder %s3827_s22, %s3823_s21 }
   0x9   : > { %s5308_s7 = smov (%p36_p0, %s34_s7), 0  ;;  %s5310_s8 = smov (!%p36_p0, %s38_s8), %s3847_s27 }
   0xa   : > { %s189_s9 = ssub.s32 %s3843_s26, %s5308_s7  ;;  %p3943_p3 = por %p206_p2, %p205_p1 }
   0xb   : > { %p40_p4 = scmp.ge.s32.totalorder %s5310_s8, 2  ;;  %p212_p6 = scmp.eq.s32.totalorder %s2734_s30, 3 }
   0xc   : > { %p2739_p7 = scmp.ge.s32.totalorder %s3851_s28, 1  ;;  %p263_p9 = scmp.lt.s32.totalorder %s3851_s28, 5 }
   0xd   : > { %s5312_s8 = smov (%p40_p4, %s5310_s8), 0  ;;  %p3952_p8 = por %p212_p6, %p211_p5 }
   0xe   : > { %s188_s12 = ssub.s32 %s3847_s27, %s5312_s8  ;;  %s195_s13 = sadd.s32 1, %s3831_s23 }
   0xf   : > { %s190_s14 = sor.u32 %s189_s9, %s188_s12  ;;  %p264_p10 = pnand %p2739_p7, %p263_p9 }
  0x10   : > { %p193_p11 = scmp.eq.s32.totalorder %s190_s14, 0 }
  0x11   : > { %267 = sbr.rel (%p264_p10) target bundleno = 691 (0x2b3), region = 44 }
  0x12   : > { %s3961_s15 = scalar_select %p193_p11, %s3831_s23, %s195_s13  }
  0x18   : > { %v323_v0 = vld [vmem:[%s5148_s2 + $0x8] sm:$0xff]  ;;  %v325_v1 = vld [vmem:[%s5148_s2 + $0x18] sm:$0xff]  ;;  %v322_v2 = vld [vmem:[%s5148_s2] sm:$0xff]  ;;  %p303_p12 = scmp.lt.s32.totalorder %s3839_s25, 1  ;;  %v3853_v7 = vmov 0.0   ;;  %vm342_vm0 = vcmask 261120   ;;  %v332_v32 = vlaneseq }
  0x19   : > { %v3458_v3 = vpack.c.bf16 %v325_v1, %v323_v0  ;;  %v324_v4 = vld [vmem:[%s5148_s2 + $0x10] sm:$0xff]  ;;  %v327_v5 = vld [vmem:[%s5148_s2 + $0x28] sm:$0xff]  ;;  %v329_v6 = vld [vmem:[%s5148_s2 + $0x38] sm:$0xff]  ;;  %410 = vmatprep.mubr.f32.mxu0 %v3853_v7  ;;  %s2742_s30 = sshll.u32 %s3835_s24, 3  ;;  %s2744_s9 = smul.u32 192, %s3835_s24 }
  0x1a   : > { %v3460_v8 = vpack.c.bf16 %v324_v4, %v322_v2  ;;  %v3462_v9 = vpack.c.bf16 %v329_v6, %v327_v5  ;;  %v326_v10 = vld [vmem:[%s5148_s2 + $0x20] sm:$0xff]  ;;  %v328_v11 = vld [vmem:[%s5148_s2 + $0x30] sm:$0xff]  ;;  %s3989_s29 = scalar_select %p303_p12, %s3839_s25, 1  ;;  %v3687_v15 = vld [vmem:[%s5150_s4 + $0x108] sm:$0xff]   ;;  %v4055_v33 = vshrl.u32 %v332_v32, 7  ;;  %v4068_v37 = vstv %s2742_s30 }
  0x1b   : > { %3459 = vmatprep.subr.bf16.mxu0 %v3458_v3  ;;  %v3685_v12 = vld [vmem:[%s5150_s4 + $0x100] sm:$0xff]   ;;  %v3464_v13 = vpack.c.bf16 %v328_v11, %v326_v10  ;;  %v3688_v17 = vld [vmem:[%s5150_s4 + $0x48] sm:$0xff]   ;;  %v3689_v18 = vld [vmem:[%s5150_s4 + $0x110] sm:$0xff]   ;;  %5182 = vst [vmem:[#allocation6_spill] sm:$0xff] %v4068_v37  ;;  %v638_v41 = vadd.s32 1, %v4068_v37  ;;  %vm651_vm3 = vcmp.ge.s32.totalorder %v4068_v37, 1 }
  0x1c   : > { %3461 = vmatpush1.bf16.msra.mxu0 %v3460_v8  ;;  %s310_s14 = scalar_lea.vmem %s5147_s1, %s3989_s29  ;;  %3298 = vmatprep.subr.bf16.mxu1 %v3685_v12  ;;  %v3686_v14 = vld [vmem:[%s5150_s4 + $0x40] sm:$0xff]   ;;  %v3690_v19 = vld [vmem:[%s5150_s4 + $0x50] sm:$0xff]   ;;  %v3691_v20 = vld [vmem:[%s5150_s4 + $0x118] sm:$0xff]   ;;  %5181 = vst [vmem:[#allocation5_spill] sm:$0xff] %v4055_v33  ;;  %s3610_s20 = smul.u32 432, %s3989_s29  ;;  %v334_v34 = vsub.s32 0, %v4055_v33 }
  0x1d   : > { %3463 = vmatprep.subr.bf16.mxu0 %v3462_v9  ;;  %v321_v16 = vld [vmem:[%s310_s14] sm:$0x1]  ;;  %3299 = vmatpush3.bf16.msra.mxu1 %v3685_v12  ;;  %v3692_v21 = vld [vmem:[%s5150_s4 + $0x58] sm:$0xff]   ;;  %v3695_v24 = vld [vmem:[%s5150_s4 + $0x128] sm:$0xff]   ;;  %v338_v36 = vsub.s32 1, %v4055_v33  ;;  %v4073_v39 = vadd.s32 16, %v4055_v33 }
  0x1e   : > { %3300 = vmatprep.subr.bf16.mxu1 %v3687_v15  ;;  %v3693_v22 = vld [vmem:[%s5150_s4 + $0x120] sm:$0xff]   ;;  %v3696_v25 = vld [vmem:[%s5150_s4 + $0x68] sm:$0xff]   ;;  %v3697_v26 = vld [vmem:[%s5150_s4 + $0x130] sm:$0xff]   ;;  %s307_s14 = scalar_lea.vmem %s5146_s0, %s3610_s20  ;;  %vm5155_vm1 = vcmp.ge.s32.totalorder %v4055_v33, 1  ;;  %vm661_vm4 = vcmp.le.s32.totalorder %v4068_v37, 16  ;;  %vm652_vm5 = vcmp.ge.s32.totalorder %v638_v41, 1 }
  0x1f   : > { %v3694_v23 = vld [vmem:[%s5150_s4 + $0x60] sm:$0xff]   ;;  %v3698_v27 = vld [vmem:[%s5150_s4 + $0x70] sm:$0xff]   ;;  %v3699_v28 = vld [vmem:[%s5150_s4 + $0x138] sm:$0xff]   ;;  %s4070_s18 = scalar_lea.vmem %s307_s14, %s2744_s9  ;;  %vm5154_vm2 = vcmp.le.s32.totalorder %v4073_v39, 16  ;;  %vm662_vm6 = vcmp.le.s32.totalorder %v638_v41, 16  ;;  %v4086_v51 = vadd.s32 2, %v4068_v37 }
  0x20   : > { %3465 = vmatpush1.bf16.msra.mxu0 %v3464_v13  ;;  %v3700_v29 = vld [vmem:[%s5150_s4 + $0x78] sm:$0xff]   ;;  %v4046_v30 = vld [vmem:[%s5150_s4 + $0x140] sm:$0xff]   ;;  %v420_v46 = vld [vmem:[%s4070_s18 + $0x8] sm:$0xff]  ;;  %v4094_v56 = vadd.s32 3, %v4068_v37  ;;  %v4097_v57 = vadd.s32 4, %v4068_v37  ;;  %v4100_v58 = vadd.s32 5, %v4068_v37 }
  0x21   : > { %3170 = vmatprep.subr.bf16.mxu0 %v3686_v14  ;;  %3301 = vmatpush3.bf16.msra.mxu1 %v3687_v15  ;;  %v4051_v31 = vld [vmem:[%s5150_s4] sm:$0xff]   ;;  %v421_v47 = vld [vmem:[%s4070_s18 + $0x10] sm:$0x3]  ;;  %v422_v49 = vld [vmem:[%s4070_s18 + $0x18] sm:$0xff]  ;;  %v4105_v60 = vadd.s32 6, %v4068_v37  ;;  %v4108_v61 = vadd.s32 7, %v4068_v37 }
  0x22   : > { %3302 = vmatprep.subr.bf16.mxu1 %v3689_v18  ;;  %v330_v35 = vld [vmem:[%s5149_s3] sm:$0x3]  ;;  %v424_v50 = vld [vmem:[%s4070_s18 + $0x28] sm:$0x3]  ;;  %v425_v54 = vld [vmem:[%s4070_s18 + $0x30] sm:$0xff]  ;;  %v4111_v62 = vadd.s32 8, %v4068_v37 }
  0x23   : > { %2743 = vmatmul.mubr.msk.f32.vlgmr.msra.gmra.mrb[0].mxu0 %vm342_vm0, %v321_v16  ;;  %v335_v38 = vrot.slane %v330_v35, %v334_v34  ;;  %v339_v40 = vrot.slane %v330_v35, %v338_v36  ;;  %v419_v43 = vld [vmem:[%s4070_s18] sm:$0xff]  ;;  %v426_v55 = vld [vmem:[%s4070_s18 + $0x38] sm:$0xff]  ;;  %vm4130_vm7 = vmand %vm651_vm3, %vm661_vm4  ;;  %vm653_vm11 = vcmp.ge.s32.totalorder %v4086_v51, 1  ;;  %vm663_vm12 = vcmp.le.s32.totalorder %v4086_v51, 16  ;;  %s300_s13 = sand.u32 1, %s3827_s22   ;;  %s3025_s19 = sshll.u32 %s3835_s24, 4 }
  0x24   : > { %3171 = vmatpush3.bf16.msra.mxu0 %v3686_v14  ;;  %v423_v53 = vld [vmem:[%s4070_s18 + $0x20] sm:$0xff]  ;;  %vm4144_vm15 = vmand %vm652_vm5, %vm662_vm6  ;;  %vm5153_vm5 = vsmask.f32 7424  ;;  %v3747_v36 = vld [vmem:[%s5150_s4 + $0x1f8] sm:$0xff]   ;;  %s2740_s14 = sshll.u32 %s300_s13, 7  ;;  %s3021_s20 = sshll.u32 %s3839_s25, 5 }
  0x25   : > { %3172 = vmatprep.subr.bf16.mxu0 %v3688_v17  ;;  %3303 = vmatpush3.bf16.msra.mxu1 %v3689_v18  ;;  %v427_v3 = vld [vmem:[%s4070_s18 + $0x40] sm:$0x3]  ;;  %vm4152_vm0 = vmand %vm4130_vm7, %vm5155_vm1  ;;  %s5048_s29 = scalar_lea.vmem [#allocation2], %s2740_s14  ;;  %s2612_s30 = sadd.s32 %s3025_s19, %s3021_s20 }
  0x26   : > { %3304 = vmatprep.subr.bf16.mxu1 %v3691_v20  ;;  %vm719_vm4 = vmand %vm4130_vm7, %vm5154_vm2  ;;  %s3022_s24 = sshll.u32 %s2612_s30, 7  ;;  %s2615_s25 = sshll.u32 %s5048_s29, 4  ;;  %s5086_s25 = int_to_ptr.vmem [resolvable:$true] %s2615_s25 }
  0x27   : > { %vm4170_vm6 = vmand %vm4144_vm15, %vm5155_vm1  ;;  %s5094_s14 = scalar_lea.sflag [#allocation3], %s300_s13  ;;  %s3757_s16 = scalar_lea.vmem %s5086_s25, 2048 }
  0x28   : > { %3173 = vmatpush3.bf16.msra.mxu0 %v3688_v17  ;;  %p3758_p13 = scmp.ne.s32.totalorder %s5086_s25, %s3757_s16  ;;  %s3854_s17 = smov [#allocation2]  }
  0x29   : > { %3174 = vmatprep.subr.bf16.mxu0 %v3690_v19  ;;  %3305 = vmatpush3.bf16.msra.mxu1 %v3691_v20  ;;  %s3761_s19 = sshll.u32 %s3854_s17, 4  ;;  %s3762_s19 = int_to_ptr.vmem [resolvable:$false] %s3761_s19 }
  0x2a   : > { %3306 = vmatprep.subr.bf16.mxu1 %v3693_v22  ;;  %p3759_p0 = pnand %p3758_p13, %p3943_p3  ;;  %s3763_s20 = scalar_lea.vmem %s3762_s19, 4096 }
  0x2b   : > { %p3764_p2 = scmp.lt.s32.totalorder %s5086_s25, %s3762_s19  ;;  %p3765_p4 = scmp.lt.s32.totalorder %s3763_s20, %s3757_s16 }
  0x2c   : > { %3175 = vmatpush3.bf16.msra.mxu0 %v3690_v19  ;;  %p3760_p1 = pneg %p3759_p0 }
  0x2d   : > { %3176 = vmatprep.subr.bf16.mxu0 %v3692_v21  ;;  %3307 = vmatpush3.bf16.msra.mxu1 %v3693_v22  ;;  %p3766_p5 = por %p3765_p4, %p3764_p2 }
  0x2e   : > { %3308 = vmatprep.subr.bf16.mxu1 %v3695_v24 }
  0x2f   : > { %p3767_p6 = pnand %p3766_p5, %p3760_p1 }
  0x30   : > { %3177 = vmatpush3.bf16.msra.mxu0 %v3692_v21 }
  0x31   : > { %3178 = vmatprep.subr.bf16.mxu0 %v3694_v23  ;;  %3309 = vmatpush3.bf16.msra.mxu1 %v3695_v24 }
  0x32   : > { %3310 = vmatprep.subr.bf16.mxu1 %v3697_v26 }
  0x34   : > { %3179 = vmatpush3.bf16.msra.mxu0 %v3694_v23 }
  0x35   : > { %3180 = vmatprep.subr.bf16.mxu0 %v3696_v25  ;;  %3311 = vmatpush3.bf16.msra.mxu1 %v3697_v26 }
  0x36   : > { %3312 = vmatprep.subr.bf16.mxu1 %v3699_v28 }
  0x38   : > { %3181 = vmatpush3.bf16.msra.mxu0 %v3696_v25 }
  0x39   : > { %3182 = vmatprep.subr.bf16.mxu0 %v3698_v27  ;;  %3313 = vmatpush3.bf16.msra.mxu1 %v3699_v28 }
  0x3a   : > { %3330 = vmatprep.subr.bf16.mxu1 %v4046_v30 }
  0x3c   : > { %3183 = vmatpush3.bf16.msra.mxu0 %v3698_v27 }
  0x3d   : > { %3184 = vmatprep.subr.bf16.mxu0 %v3700_v29 }
  0x40   : > { %3185 = vmatpush3.bf16.msra.mxu0 %v3700_v29 }
  0x41   : > { %3202 = vmatprep.subr.bf16.mxu0 %v4051_v31 }
  0xf6   : > { %v412_v42 = vpop.f32.mrb[0].mxu0 }
  0xf7   : > { %v413_v44 = vadd.f32 %v412_v42, %v335_v38  ;;  %v414_v45 = vpop.f32.mrb[1].mxu0 }
  0xf8   : > { %v415_v48 = vadd.f32 %v414_v45, %v339_v40 }
  0xf9   : > { %v4088_v52 = vrot.slane %v413_v44, %v334_v34 }
  0xfa   : > { %v4102_v59 = vrot.slane %v415_v48, %v334_v34 }
  0xfb   : > { %v453_v63 = vmul.f32 %v4088_v52, %v419_v43  ;;  %v454_v0 = vmul.f32 %v4088_v52, %v420_v46  ;;  %v455_v1 = vmul.f32 %v4088_v52, %v421_v47  ;;  %v456_v2 = vmul.f32 %v4088_v52, %v422_v49 }
  0xfc   : > { %5183 = vst [vmem:[#allocation7_spill] sm:$0xff] %v4102_v59  ;;  %v457_v4 = vmul.f32 %v4088_v52, %v423_v53  ;;  %v458_v5 = vmul.f32 %v4088_v52, %v424_v50  ;;  %v459_v6 = vmul.f32 %v4088_v52, %v425_v54  ;;  %v460_v7 = vmul.f32 %v4088_v52, %v426_v55 }
  0xfd   : > { %v487_v8 = vadd.f32 %v4102_v59, %v453_v63  ;;  %v488_v9 = vadd.f32 %v4102_v59, %v454_v0  ;;  %v489_v10 = vadd.f32 %v4102_v59, %v455_v1  ;;  %v490_v11 = vadd.f32 %v4102_v59, %v456_v2 }
  0xfe   : > { %v491_v13 = vadd.f32 %v4102_v59, %v457_v4  ;;  %v492_v14 = vadd.f32 %v4102_v59, %v458_v5  ;;  %v461_v15 = vmul.f32 %v4088_v52, %v427_v3  ;;  %v4138_v16 = vadd.f32 %v4102_v59, %v459_v6  ;;  %v428_v4 = vld [vmem:[%s4070_s18 + $0x48] sm:$0xff] }
  0xff   : > { %vm517_vm8 = vcmp.ge.f32.partialorder %v487_v8, 0.0  ;;  %vm518_vm9 = vcmp.ge.f32.partialorder %v488_v9, 0.0  ;;  %vm519_vm10 = vcmp.ge.f32.partialorder %v489_v10, 0.0  ;;  %v547_v17 = vmul.f32 0.2, %v487_v8 }
 0x100   : > { %v548_v18 = vmul.f32 0.2, %v488_v9  ;;  %v549_v19 = vmul.f32 0.2, %v489_v10  ;;  %vm520_vm13 = vcmp.ge.f32.partialorder %v490_v11, 0.0  ;;  %vm521_vm14 = vcmp.ge.f32.partialorder %v491_v13, 0.0 }
 0x101   : > { %v577_v21 = vsel %vm517_vm8, %v487_v8, %v547_v17  ;;  %vm522_vm3 = vcmp.ge.f32.partialorder %v492_v14, 0.0  ;;  %v550_v23 = vmul.f32 0.2, %v490_v11  ;;  %v551_v24 = vmul.f32 0.2, %v491_v13  ;;  %vm722_vm8 = vmand %vm4144_vm15, %vm5154_vm2 }
 0x102   : > { %v578_v25 = vsel %vm518_vm9, %v488_v9, %v548_v18  ;;  %v579_v26 = vsel %vm519_vm10, %v489_v10, %v549_v19  ;;  %v4156_v27 = vmul.f32 1.4142135, %v577_v21  ;;  %v552_v28 = vmul.f32 0.2, %v492_v14 }
 0x103   : > { %v4162_v29 = vmul.f32 1.4142135, %v578_v25  ;;  %v609_v32 = vmul.f32 1.4142135, %v579_v26  ;;  %v580_v34 = vsel %vm520_vm13, %v490_v11, %v550_v23  ;;  %v581_v35 = vsel %vm521_vm14, %v491_v13, %v551_v24  ;;  %v430_v13 = vld [vmem:[%s4070_s18 + $0x58] sm:$0x3] }
 0x104   : > { %v747_v38 = vsel %vm4152_vm0, %v4156_v27, 0.0  ;;  %v582_v40 = vsel %vm522_vm3, %v492_v14, %v552_v28  ;;  %v610_v41 = vmul.f32 1.4142135, %v580_v34  ;;  %v611_v42 = vmul.f32 1.4142135, %v581_v35  ;;  %v431_v34 = vld [vmem:[%s4070_s18 + $0x60] sm:$0xff] }
 0x105   : > { %v748_v43 = vsel %vm4130_vm7, %v4162_v29, 0.0  ;;  %v749_v44 = vsel %vm719_vm4, %v609_v32, 0.0  ;;  %v612_v45 = vmul.f32 1.4142135, %v582_v40  ;;  %v494_v46 = vadd.f32 %v4102_v59, %v460_v7  ;;  %v429_v7 = vld [vmem:[%s4070_s18 + $0x50] sm:$0xff]  ;;  %vm4215_vm4 = vmand %vm653_vm11, %vm663_vm12 }
 0x106   : > { %v4185_v47 = vpack.c.bf16 %v748_v43, %v747_v38  ;;  %v4187_v48 = vpack.c.bf16 %v749_v44, %v749_v44  ;;  %v750_v49 = vsel %vm4170_vm6, %v610_v41, 0.0  ;;  %v751_v50 = vsel %vm4144_vm15, %v611_v42, 0.0  ;;  %vm4231_vm11 = vmand %vm4215_vm4, %vm5155_vm1 }
 0x107   : > { %vm654_vm9 = vcmp.ge.s32.totalorder %v4094_v56, 1  ;;  %vm664_vm10 = vcmp.le.s32.totalorder %v4094_v56, 16  ;;  %v752_v53 = vsel %vm722_vm8, %v612_v45, 0.0  ;;  %v4195_v54 = vpack.c.bf16 %v751_v50, %v750_v49 }
 0x108   : > { %v4197_v55 = vpack.c.bf16 %v611_v42, %v610_v41  ;;  %v495_v63 = vadd.f32 %v4102_v59, %v461_v15  ;;  %v815_v0 = vshrl.u32 %v4185_v47, 16  ;;  %v817_v1 = vshll.u32 %v4185_v47, 16  ;;  %v3704_v41 = vld [vmem:[%s5150_s4 + $0x8] sm:$0xff]  }
 0x109   : > { %v822_v2 = vshll.u32 %v4187_v48, 16  ;;  %v4203_v3 = vpack.c.bf16 %v752_v53, %v752_v53  ;;  %v827_v5 = vshrl.u32 %v4195_v54, 16  ;;  %v829_v6 = vshll.u32 %v4195_v54, 16  ;;  %v432_v53 = vld [vmem:[%s4070_s18 + $0x68] sm:$0xff] }
 0x10a   : > { %vm523_vm13 = vcmp.ge.f32.partialorder %v4138_v16, 0.0  ;;  %vm524_vm14 = vcmp.ge.f32.partialorder %v494_v46, 0.0  ;;  %v819_v8 = vrot.slane %v817_v1, 1  ;;  %vm525_vm3 = vcmp.ge.f32.partialorder %v495_v63, 0.0 }
 0x10b   : > { %v824_v9 = vrot.slane %v822_v2, 1  ;;  %v834_v10 = vshll.u32 %v4203_v3, 16  ;;  %v831_v14 = vrot.slane %v829_v6, 1  ;;  %v553_v15 = vmul.f32 0.2, %v4138_v16 }
 0x10c   : > { %v554_v17 = vmul.f32 0.2, %v494_v46  ;;  %v462_v18 = vmul.f32 %v4088_v52, %v428_v4  ;;  %v820_v19 = vor.u32 %v819_v8, %v815_v0  ;;  %v555_v23 = vmul.f32 0.2, %v495_v63  ;;  %v433_v4 = vld [vmem:[%s4070_s18 + $0x70] sm:$0x3] }
 0x10d   : > { %v836_v21 = vrot.slane %v834_v10, 1  ;;  %v463_v24 = vmul.f32 %v4088_v52, %v429_v7  ;;  %v832_v25 = vor.u32 %v831_v14, %v827_v5  ;;  %v583_v51 = vsel %vm523_vm13, %v4138_v16, %v553_v15  ;;  %vm725_vm13 = vmand %vm4215_vm4, %vm5154_vm2 }
 0x10e   : > { %v584_v26 = vsel %vm524_vm14, %v494_v46, %v554_v17  ;;  %v464_v32 = vmul.f32 %v4088_v52, %v430_v13  ;;  %vm665_vm8 = vcmp.le.s32.totalorder %v4097_v57, 16  ;;  %v825_v35 = vsel %vm5153_vm5, %v820_v19, %v824_v9  ;;  %v3724_v17 = vld [vmem:[%s5150_s4 + $0x98] sm:$0xff]  }
 0x10f   : > { %v585_v16 = vsel %vm525_vm3, %v495_v63, %v555_v23  ;;  %v4241_v38 = vmul.f32 1.4142135, %v583_v51  ;;  %v4243_v40 = vmul.f32 1.4142135, %v584_v26  ;;  %3186 = vmatprep.mubr.bf16.mxu0 %v825_v35  ;;  %v837_v42 = vsel %vm5153_vm5, %v832_v25, %v836_v21  ;;  %vm4271_vm5 = vmand %vm654_vm9, %vm664_vm10 }
 0x110   : > { %v615_v43 = vmul.f32 1.4142135, %v585_v16  ;;  %v496_v44 = vadd.f32 %v4102_v59, %v462_v18  ;;  %v497_v45 = vadd.f32 %v4102_v59, %v463_v24  ;;  %3314 = vmatprep.mubr.bf16.mxu1 %v837_v42  ;;  %3187 = vmatmul.mubr.bf16.vlgmr.msra.gmra.mrb[4].mxu0 %v837_v42  ;;  %v498_v50 = vadd.f32 %v4102_v59, %v464_v32  ;;  %vm4289_vm9 = vmand %vm4271_vm5, %vm5155_vm1  ;;  %v434_v42 = vld [vmem:[%s4070_s18 + $0x78] sm:$0xff] }
 0x111   : > { %v753_v46 = vsel %vm4231_vm11, %v4241_v38, 0.0  ;;  %v754_v49 = vsel %vm4215_vm4, %v4243_v40, 0.0  ;;  %v465_v63 = vmul.f32 %v4088_v52, %v431_v34  ;;  %3203 = vmatpush3.bf16.msra.mxu0 %v4051_v31  ;;  %v3706_v31 = vld [vmem:[%s5150_s4 + $0x10] sm:$0xff]   ;;  %v466_v10 = vmul.f32 %v4088_v52, %v432_v53  ;;  %vm728_vm10 = vmand %vm4271_vm5, %vm5154_vm2 }
 0x112   : > { %v755_v0 = vsel %vm725_vm13, %v615_v43, 0.0  ;;  %v4264_v1 = vpack.c.bf16 %v754_v49, %v753_v46  ;;  %vm526_vm14 = vcmp.ge.f32.partialorder %v496_v44, 0.0  ;;  %vm527_vm3 = vcmp.ge.f32.partialorder %v497_v45, 0.0  ;;  %3204 = vmatprep.subr.bf16.mxu0 %v3704_v41  ;;  %v3708_v43 = vld [vmem:[%s5150_s4 + $0x18] sm:$0xff]   ;;  %v3703_v46 = vld [vmem:[%s5150_s4 + $0x148] sm:$0xff]  }
 0x113   : > { %v4276_v5 = vpack.c.bf16 %v755_v0, %v755_v0  ;;  %vm528_vm12 = vcmp.ge.f32.partialorder %v498_v50, 0.0  ;;  %v556_v6 = vmul.f32 0.2, %v496_v44  ;;  %v557_v7 = vmul.f32 0.2, %v497_v45 }
 0x114   : > { %v839_v8 = vshrl.u32 %v4264_v1, 16  ;;  %v841_v9 = vshll.u32 %v4264_v1, 16  ;;  %v558_v56 = vmul.f32 0.2, %v498_v50  ;;  %v467_v18 = vmul.f32 %v4088_v52, %v433_v4  ;;  %v436_v4 = vld [vmem:[%s4070_s18 + $0x88] sm:$0x3] }
 0x115   : > { %v846_v13 = vshll.u32 %v4276_v5, 16  ;;  %v586_v14 = vsel %vm526_vm14, %v496_v44, %v556_v6  ;;  %v587_v15 = vsel %vm527_vm3, %v497_v45, %v557_v7  ;;  %3205 = vmatpush3.bf16.msra.mxu0 %v3704_v41  ;;  %v499_v26 = vadd.f32 %v4102_v59, %v465_v63  ;;  %v3710_v6 = vld [vmem:[%s5150_s4 + $0x20] sm:$0xff]  }
 0x116   : > { %v843_v19 = vrot.slane %v841_v9, 1  ;;  %v588_v21 = vsel %vm528_vm12, %v498_v50, %v558_v56  ;;  %v4294_v23 = vmul.f32 1.4142135, %v586_v14  ;;  %v4296_v24 = vmul.f32 1.4142135, %v587_v15  ;;  %3206 = vmatprep.subr.bf16.mxu0 %v3706_v31  ;;  %v435_v50 = vld [vmem:[%s4070_s18 + $0x80] sm:$0xff] }
 0x117   : > { %v848_v25 = vrot.slane %v846_v13, 1  ;;  %v618_v51 = vmul.f32 1.4142135, %v588_v21  ;;  %v500_v32 = vadd.f32 %v4102_v59, %v466_v10  ;;  %v501_v41 = vadd.f32 %v4102_v59, %v467_v18 }
 0x118   : > { %v844_v34 = vor.u32 %v843_v19, %v839_v8  ;;  %v756_v35 = vsel %vm4289_vm9, %v4294_v23, 0.0  ;;  %v757_v16 = vsel %vm4271_vm5, %v4296_v24, 0.0  ;;  %vm529_vm12 = vcmp.ge.f32.partialorder %v499_v26, 0.0 }
 0x119   : > { %v758_v44 = vsel %vm728_vm10, %v618_v51, 0.0  ;;  %v4317_v45 = vpack.c.bf16 %v757_v16, %v756_v35  ;;  %vm530_vm3 = vcmp.ge.f32.partialorder %v500_v32, 0.0  ;;  %vm5200_vm13 = vcmp.ge.s32.totalorder %v4097_v57, 1  ;;  %3207 = vmatpush3.bf16.msra.mxu0 %v3706_v31  ;;  %v437_v51 = vld [vmem:[%s4070_s18 + $0x90] sm:$0xff] }
 0x11a   : > { %vm4326_vm14 = vmand %vm5200_vm13, %vm665_vm8  ;;  %v5201_v49 = vmov 0  ;;  %vm5203_vm2 = vsmask.f32 7424  ;;  %v4334_v63 = vpack.c.bf16 %v758_v44, %v758_v44  ;;  %vm531_vm10 = vcmp.ge.f32.partialorder %v501_v41, 0.0  ;;  %3208 = vmatprep.subr.bf16.mxu0 %v3708_v43 }
 0x11b   : > { %v5202_v49 = vsel %vm4326_vm14, 4294967295, %v5201_v49  ;;  %v4332_v53 = vsel %vm5203_vm2, %v844_v34, %v848_v25  ;;  %v559_v0 = vmul.f32 0.2, %v499_v26  ;;  %v851_v57 = vshrl.u32 %v4317_v45, 16  ;;  %vm4351_vm2 = vmand %vm4326_vm14, %vm5155_vm1 }
 0x11c   : > { %5204 = vst [vmem:[#allocation8_spill] sm:$0xff] %v4332_v53  ;;  %3315 = vmatmul.mubr.bf16.vlgmr.msra.gmra.mrb[0].mxu1 %v4332_v53  ;;  %3190 = vmatprep.mubr.bf16.mxu0 %v4332_v53  ;;  %v853_v7 = vshll.u32 %v4317_v45, 16  ;;  %v560_v8 = vmul.f32 0.2, %v500_v32  ;;  %v561_v9 = vmul.f32 0.2, %v501_v41  ;;  %v468_v13 = vmul.f32 %v4088_v52, %v434_v42 }
 0x11d   : > { %3331 = vmatpush3.bf16.msra.mxu1 %v4046_v30  ;;  %v858_v31 = vshll.u32 %v4334_v63, 16  ;;  %v589_v56 = vsel %vm529_vm12, %v499_v26, %v559_v0  ;;  %v5205_v10 = vmov 0  ;;  %v469_v14 = vmul.f32 %v4088_v52, %v435_v50  ;;  %v3705_v30 = vld [vmem:[%s5150_s4 + $0x150] sm:$0xff]   ;;  %3209 = vmatpush3.bf16.msra.mxu0 %v3708_v43 }
 0x11e   : > { %v5206_v10 = vsel %vm4351_vm2, 4294967295, %v5205_v10  ;;  %v855_v15 = vrot.slane %v853_v7, 1  ;;  %3332 = vmatprep.subr.bf16.mxu1 %v3703_v46  ;;  %v590_v18 = vsel %vm530_vm3, %v500_v32, %v560_v8  ;;  %v591_v19 = vsel %vm531_vm10, %v501_v41, %v561_v9  ;;  %3210 = vmatprep.subr.bf16.mxu0 %v3710_v6 }
 0x11f   : > { %v4362_v21 = vmul.f32 1.4142135, %v589_v56  ;;  %vm5207_vm8 = vcmp.le.s32.totalorder %v4073_v39, 16  ;;  %v860_v26 = vrot.slane %v858_v31, 1  ;;  %v4373_v34 = vmul.f32 1.4142135, %v590_v18 }
 0x120   : > { %vm4368_vm13 = vmand %vm4326_vm14, %vm5207_vm8  ;;  %v621_v35 = vmul.f32 1.4142135, %v591_v19  ;;  %v470_v32 = vmul.f32 %v4088_v52, %v436_v4  ;;  %v856_v16 = vor.u32 %v855_v15, %v851_v57  ;;  %v502_v42 = vadd.f32 %v4102_v59, %v468_v13  ;;  %v438_v4 = vld [vmem:[%s4070_s18 + $0x98] sm:$0xff]  ;;  %v439_v57 = vld [vmem:[%s4070_s18 + $0xa0] sm:$0x3] }
 0x121   : > { %v759_v41 = vsel %vm4351_vm2, %v4362_v21, 0.0  ;;  %v503_v44 = vadd.f32 %v4102_v59, %v469_v14  ;;  %3333 = vmatpush3.bf16.msra.mxu1 %v3703_v46  ;;  %v760_v50 = vsel %vm4326_vm14, %v4373_v34, 0.0  ;;  %v471_v7 = vmul.f32 %v4088_v52, %v437_v51  ;;  %v3707_v56 = vld [vmem:[%s5150_s4 + $0x158] sm:$0xff]   ;;  %v3712_v13 = vld [vmem:[%s5150_s4 + $0x28] sm:$0xff]   ;;  %3211 = vmatpush3.bf16.msra.mxu0 %v3710_v6  ;;  %v3714_v6 = vld [vmem:[%s5150_s4 + $0x30] sm:$0xff]  }
 0x122   : > { %v761_v43 = vsel %vm4368_vm13, %v621_v35, 0.0  ;;  %v504_v0 = vadd.f32 %v4102_v59, %v470_v32  ;;  %vm5210_vm10 = vsmask.f32 7424  ;;  %3334 = vmatprep.subr.bf16.mxu1 %v3705_v30  ;;  %v4395_v9 = vpack.c.bf16 %v760_v50, %v759_v41  ;;  %v440_v41 = vld [vmem:[%s4070_s18 + $0xa8] sm:$0xff]  ;;  %3212 = vmatprep.subr.bf16.mxu0 %v3712_v13 }
 0x123   : > { %v4393_v8 = vsel %vm5210_vm10, %v856_v16, %v860_v26  ;;  %v4397_v46 = vpack.c.bf16 %v761_v43, %v761_v43  ;;  %vm532_vm8 = vcmp.ge.f32.partialorder %v502_v42, 0.0  ;;  %vm5212_vm12 = vcmp.le.s32.totalorder %v4100_v58, 16  ;;  %v3709_v43 = vld [vmem:[%s5150_s4 + $0x160] sm:$0xff]  }
 0x124   : > { %5211 = vst [vmem:[#allocation9_spill] sm:$0xff] %v4393_v8  ;;  %vm5213_vm3 = vcmp.ge.s32.totalorder %v4100_v58, 1  ;;  %v5214_v31 = vmov 0  ;;  %3318 = vmatprep.mubr.bf16.mxu1 %v4393_v8  ;;  %3191 = vmatmul.mubr.bf16.gmra.mrb[8].mxu0 %v4393_v8  ;;  %vm533_vm10 = vcmp.ge.f32.partialorder %v503_v44, 0.0  ;;  %v562_v58 = vmul.f32 0.2, %v502_v42 }
 0x125   : > { %vm4403_vm13 = vmand %vm5213_vm3, %vm5212_vm12  ;;  %v563_v14 = vmul.f32 0.2, %v503_v44  ;;  %v863_v15 = vshrl.u32 %v4395_v9, 16  ;;  %v865_v18 = vshll.u32 %v4395_v9, 16  ;;  %v870_v19 = vshll.u32 %v4397_v46, 16  ;;  %3335 = vmatpush3.bf16.msra.mxu1 %v3705_v30  ;;  %3213 = vmatpush3.bf16.msra.mxu0 %v3712_v13 }
 0x126   : > { %v5215_v31 = vsel %vm4403_vm13, 4294967295, %v5214_v31  ;;  %v564_v25 = vmul.f32 0.2, %v504_v0  ;;  %v592_v51 = vsel %vm532_vm8, %v502_v42, %v562_v58  ;;  %vm5216_vm12 = vcmp.ge.s32.totalorder %v4055_v33, 1  ;;  %3336 = vmatprep.subr.bf16.mxu1 %v3707_v56  ;;  %3214 = vmatprep.subr.bf16.mxu0 %v3714_v6 }
 0x127   : > { %v593_v26 = vsel %vm533_vm10, %v503_v44, %v563_v14  ;;  %vm4423_vm3 = vmand %vm4403_vm13, %vm5216_vm12  ;;  %v5217_v35 = vmov 0  ;;  %v472_v32 = vmul.f32 %v4088_v52, %v438_v4  ;;  %v473_v16 = vmul.f32 %v4088_v52, %v439_v57 }
 0x128   : > { %v5218_v35 = vsel %vm4423_vm3, 4294967295, %v5217_v35  ;;  %v867_v30 = vrot.slane %v865_v18, 1  ;;  %v872_v42 = vrot.slane %v870_v19, 1  ;;  %vm5219_vm8 = vcmp.ge.f32.partialorder %v504_v0, 0.0 }
 0x129   : > { %v594_v44 = vsel %vm5219_vm8, %v504_v0, %v564_v25  ;;  %v4436_v50 = vmul.f32 1.4142135, %v592_v51  ;;  %vm5220_vm10 = vcmp.le.s32.totalorder %v4073_v39, 16  ;;  %v4445_v4 = vmul.f32 1.4142135, %v593_v26  ;;  %v441_v25 = vld [vmem:[%s4070_s18 + $0xb0] sm:$0xff]  ;;  %3337 = vmatpush3.bf16.msra.mxu1 %v3707_v56  ;;  %3215 = vmatpush3.bf16.msra.mxu0 %v3714_v6 }
 0x12a   : > { %vm734_vm12 = vmand %vm4403_vm13, %vm5220_vm10  ;;  %v624_v57 = vmul.f32 1.4142135, %v594_v44  ;;  %v505_v58 = vadd.f32 %v4102_v59, %v471_v7  ;;  %v506_v0 = vadd.f32 %v4102_v59, %v472_v32  ;;  %v868_v14 = vor.u32 %v867_v30, %v863_v15  ;;  %v442_v7 = vld [vmem:[%s4070_s18 + $0xb8] sm:$0x3]  ;;  %3338 = vmatprep.subr.bf16.mxu1 %v3709_v43  ;;  %v3711_v56 = vld [vmem:[%s5150_s4 + $0x168] sm:$0xff]  }
 0x12b   : > { %5221 = vst [vmem:[#allocation10_spill] sm:$0xff] %v4445_v4  ;;  %v762_v18 = vsel %vm4423_vm3, %v4436_v50, 0.0  ;;  %v507_v19 = vadd.f32 %v4102_v59, %v473_v16  ;;  %v474_v51 = vmul.f32 %v4088_v52, %v440_v41  ;;  %v763_v26 = vsel %vm4403_vm13, %v4445_v4, 0.0  ;;  %v3716_v41 = vld [vmem:[%s5150_s4 + $0x38] sm:$0xff]   ;;  %v3713_v6 = vld [vmem:[%s5150_s4 + $0x170] sm:$0xff]  }
 0x12c   : > { %v764_v44 = vsel %vm734_vm12, %v624_v57, 0.0  ;;  %vm535_vm8 = vcmp.ge.f32.partialorder %v505_v58, 0.0  ;;  %vm536_vm10 = vcmp.ge.f32.partialorder %v506_v0, 0.0  ;;  %vm5222_vm1 = vsmask.f32 7424  ;;  %3216 = vmatprep.subr.bf16.mxu0 %v3716_v41 }
 0x12d   : > { %v4460_v15 = vsel %vm5222_vm1, %v868_v14, %v872_v42  ;;  %v4462_v32 = vpack.c.bf16 %v763_v26, %v762_v18  ;;  %v4464_v16 = vpack.c.bf16 %v764_v44, %v764_v44  ;;  %vm537_vm14 = vcmp.ge.f32.partialorder %v507_v19, 0.0  ;;  %3339 = vmatpush3.bf16.msra.mxu1 %v3709_v43  ;;  %3217 = vmatpush3.bf16.msra.mxu0 %v3716_v41  ;;  %v3715_v41 = vld [vmem:[%s5150_s4 + $0x178] sm:$0xff]  }
 0x12e   : > { %5223 = vst [vmem:[#allocation11_spill] sm:$0xff] %v4460_v15  ;;  %vm5224_vm3 = vcmp.le.s32.totalorder %v4105_v60, 16  ;;  %vm5225_vm2 = vcmp.ge.s32.totalorder %v4105_v60, 1  ;;  %v5226_v13 = vmov 0  ;;  %3319 = vmatmul.mubr.bf16.gmra.mrb[4].mxu1 %v4460_v15  ;;  %3194 = vmatprep.mubr.bf16.mxu0 %v4460_v15  ;;  %v565_v30 = vmul.f32 0.2, %v505_v58 }
 0x12f   : > { %vm4470_vm13 = vmand %vm5225_vm2, %vm5224_vm3  ;;  %v566_v42 = vmul.f32 0.2, %v506_v0  ;;  %v567_v57 = vmul.f32 0.2, %v507_v19  ;;  %v475_v60 = vmul.f32 %v4088_v52, %v441_v25  ;;  %v875_v14 = vshrl.u32 %v4462_v32, 16  ;;  %3340 = vmatprep.subr.bf16.mxu1 %v3711_v56 }
 0x130   : > { %v5227_v13 = vsel %vm4470_vm13, 4294967295, %v5226_v13  ;;  %v877_v18 = vshll.u32 %v4462_v32, 16  ;;  %v882_v26 = vshll.u32 %v4464_v16, 16  ;;  %v476_v44 = vmul.f32 %v4088_v52, %v442_v7 }
 0x131   : > { %5228 = vst [vmem:[#allocation12_spill] sm:$0xff] %v5227_v13  ;;  %v595_v8 = vsel %vm535_vm8, %v505_v58, %v565_v30  ;;  %v596_v53 = vsel %vm536_vm10, %v506_v0, %v566_v42  ;;  %v597_v15 = vsel %vm537_vm14, %v507_v19, %v567_v57  ;;  %vm5229_vm1 = vcmp.ge.s32.totalorder %v4055_v33, 1  ;;  %v4507_v58 = vld [vmem:[%s5150_s4 + $0x80] sm:$0xff]   ;;  %3341 = vmatpush3.bf16.msra.mxu1 %v3711_v56 }
 0x132   : > { %vm4494_vm2 = vmand %vm4470_vm13, %vm5229_vm1  ;;  %v5230_v25 = vmov 0  ;;  %v508_v37 = vadd.f32 %v4102_v59, %v474_v51  ;;  %v879_v0 = vrot.slane %v877_v18, 1  ;;  %v884_v19 = vrot.slane %v882_v26, 1  ;;  %3234 = vmatprep.subr.bf16.mxu0 %v4507_v58  ;;  %3342 = vmatprep.subr.bf16.mxu1 %v3713_v6 }
 0x133   : > { %v5231_v25 = vsel %vm4494_vm2, 4294967295, %v5230_v25  ;;  %v4509_v7 = vmul.f32 1.4142135, %v595_v8  ;;  %v4511_v43 = vmul.f32 1.4142135, %v596_v53  ;;  %vm5235_vm14 = vcmp.le.s32.totalorder %v4073_v39, 16 }
 0x134   : > { %5232 = vst [vmem:[#allocation13_spill] sm:$0xff] %v5231_v25  ;;  %vm737_vm8 = vmand %vm4470_vm13, %vm5235_vm14  ;;  %v627_v51 = vmul.f32 1.4142135, %v597_v15  ;;  %v509_v30 = vadd.f32 %v4102_v59, %v475_v60  ;;  %v510_v42 = vadd.f32 %v4102_v59, %v476_v44  ;;  %v880_v57 = vor.u32 %v879_v0, %v875_v14  ;;  %v443_v60 = vld [vmem:[%s4070_s18 + $0xc0] sm:$0xff] }
 0x135   : > { %5233 = vst [vmem:[#allocation14_spill] sm:$0xff] %v4509_v7  ;;  %5234 = vst [vmem:[#allocation15_spill] sm:$0xff] %v4511_v43  ;;  %v765_v8 = vsel %vm4494_vm2, %v4509_v7, 0.0  ;;  %v766_v53 = vsel %vm4470_vm13, %v4511_v43, 0.0  ;;  %v568_v18 = vmul.f32 0.2, %v508_v37  ;;  %3343 = vmatpush3.bf16.msra.mxu1 %v3713_v6 }
 0x136   : > { %vm5236_vm1 = vcmp.le.s32.totalorder %v4108_v61, 16  ;;  %vm5237_vm14 = vcmp.ge.s32.totalorder %v4108_v61, 1  ;;  %v5238_v15 = vmov 0  ;;  %v767_v14 = vsel %vm737_vm8, %v627_v51, 0.0  ;;  %v444_v7 = vld [vmem:[%s4070_s18 + $0xc8] sm:$0xff]  ;;  %3344 = vmatprep.subr.bf16.mxu1 %v3715_v41  ;;  %v4585_v6 = vld [vmem:[%s5150_s4 + $0x180] sm:$0xff]  }
 0x137   : > { %vm4529_vm3 = vmand %vm5237_vm14, %vm5236_vm1  ;;  %v4534_v26 = vpack.c.bf16 %v766_v53, %v765_v8  ;;  %vm539_vm12 = vcmp.ge.f32.partialorder %v509_v30, 0.0  ;;  %vm540_vm10 = vcmp.ge.f32.partialorder %v510_v42, 0.0  ;;  %vm5241_vm13 = vsmask.f32 7424  ;;  %v445_v8 = vld [vmem:[%s4070_s18 + $0xd0] sm:$0x3] }
 0x138   : > { %v5239_v15 = vsel %vm4529_vm3, 4294967295, %v5238_v15  ;;  %v4538_v44 = vsel %vm5241_vm13, %v880_v57, %v884_v19  ;;  %v4540_v0 = vpack.c.bf16 %v767_v14, %v767_v14  ;;  %v569_v61 = vmul.f32 0.2, %v509_v30 }
 0x139   : > { %5240 = vst [vmem:[#allocation16_spill] sm:$0xff] %v4534_v26  ;;  %5242 = vst [vmem:[#allocation17_spill] sm:$0xff] %v4538_v44  ;;  %v570_v43 = vmul.f32 0.2, %v510_v42  ;;  %3322 = vmatprep.mubr.bf16.mxu1 %v4538_v44  ;;  %3195 = vmatmul.mubr.bf16.gmra.mrb[12].mxu0 %v4538_v44  ;;  %v887_v56 = vshrl.u32 %v4534_v26, 16  ;;  %v889_v51 = vshll.u32 %v4534_v26, 16  ;;  %v477_v53 = vmul.f32 %v4088_v52, %v443_v60 }
 0x13a   : > { %vm5243_vm13 = vcmp.ge.f32.partialorder %v508_v37, 0.0  ;;  %vm5244_vm8 = vcmp.ge.s32.totalorder %v4055_v33, 1  ;;  %v5245_v57 = vmov 0  ;;  %v894_v14 = vshll.u32 %v4540_v0, 16  ;;  %3345 = vmatpush3.bf16.msra.mxu1 %v3715_v41 }
 0x13b   : > { %v598_v19 = vsel %vm5243_vm13, %v508_v37, %v568_v18  ;;  %vm4555_vm1 = vmand %vm4529_vm3, %vm5244_vm8  ;;  %v599_v44 = vsel %vm539_vm12, %v509_v30, %v569_v61  ;;  %v600_v13 = vsel %vm540_vm10, %v510_v42, %v570_v43  ;;  %vm5247_vm14 = vcmp.le.s32.totalorder %v4073_v39, 16  ;;  %3362 = vmatprep.subr.bf16.mxu1 %v4585_v6 }
 0x13c   : > { %v5246_v57 = vsel %vm4555_vm1, 4294967295, %v5245_v57  ;;  %v4564_v26 = vmul.f32 1.4142135, %v598_v19  ;;  %vm740_vm13 = vmand %vm4529_vm3, %vm5247_vm14  ;;  %v891_v37 = vrot.slane %v889_v51, 1  ;;  %v4570_v18 = vmul.f32 1.4142135, %v599_v44 }
 0x13d   : > { %v630_v25 = vmul.f32 1.4142135, %v600_v13  ;;  %v478_v4 = vmul.f32 %v4088_v52, %v444_v7  ;;  %v896_v60 = vrot.slane %v894_v14, 1  ;;  %v479_v43 = vmul.f32 %v4088_v52, %v445_v8 }
 0x13e   : > { %v768_v30 = vsel %vm4555_vm1, %v4564_v26, 0.0  ;;  %v511_v42 = vadd.f32 %v4102_v59, %v477_v53  ;;  %v892_v61 = vor.u32 %v891_v37, %v887_v56  ;;  %v769_v44 = vsel %vm4529_vm3, %v4570_v18, 0.0 }
 0x13f   : > { %v770_v51 = vsel %vm740_vm13, %v630_v25, 0.0  ;;  %v512_v13 = vadd.f32 %v4102_v59, %v478_v4  ;;  %v4587_v7 = vpack.c.bf16 %v769_v44, %v768_v30  ;;  %v513_v8 = vadd.f32 %v4102_v59, %v479_v43 }
 0x140   : > { %v4589_v19 = vpack.c.bf16 %v770_v51, %v770_v51  ;;  %vm541_vm12 = vcmp.ge.f32.partialorder %v511_v42, 0.0  ;;  %vm5248_vm10 = vcmp.le.s32.totalorder %v4111_v62, 16  ;;  %vm5249_vm8 = vcmp.ge.s32.totalorder %v4111_v62, 1 }
 0x141   : > { %vm4596_vm14 = vmand %vm5249_vm8, %vm5248_vm10  ;;  %vm5252_vm13 = vsmask.f32 7424  ;;  %vm542_vm3 = vcmp.ge.f32.partialorder %v512_v13, 0.0  ;;  %v571_v56 = vmul.f32 0.2, %v511_v42  ;;  %v901_v14 = vshll.u32 %v4587_v7, 16 }
 0x142   : > { %v4601_v4 = vsel %vm5252_vm13, %v892_v61, %v896_v60  ;;  %v572_v53 = vmul.f32 0.2, %v512_v13  ;;  %v906_v37 = vshll.u32 %v4589_v19, 16  ;;  %vm543_vm1 = vcmp.ge.f32.partialorder %v513_v8, 0.0 }
 0x143   : > { %5253 = vst [vmem:[#allocation18_spill] sm:$0xff] %v4601_v4  ;;  %3323 = vmatmul.mubr.bf16.gmra.mrb[8].mxu1 %v4601_v4  ;;  %3198 = vmatprep.mubr.bf16.mxu0 %v4601_v4  ;;  %v573_v62 = vmul.f32 0.2, %v513_v8  ;;  %v601_v30 = vsel %vm541_vm12, %v511_v42, %v571_v56  ;;  %vm5254_vm10 = vcmp.ge.s32.totalorder %v4055_v33, 1  ;;  %v899_v41 = vshrl.u32 %v4587_v7, 16 }
 0x144   : > { %v602_v43 = vsel %vm542_vm3, %v512_v13, %v572_v53  ;;  %vm4611_vm8 = vmand %vm4596_vm14, %vm5254_vm10  ;;  %v903_v61 = vrot.slane %v901_v14, 1  ;;  %v631_v44 = vmul.f32 1.4142135, %v601_v30  ;;  %v908_v4 = vrot.slane %v906_v37, 1 }
 0x145   : > { %v632_v51 = vmul.f32 1.4142135, %v602_v43  ;;  %v603_v59 = vsel %vm543_vm1, %v513_v8, %v573_v62  ;;  %vm5257_vm12 = vcmp.le.s32.totalorder %v4073_v39, 16  ;;  %vm2777_vm1 = vmpackc.low %vm4130_vm7, %vm4152_vm0  ;;  %v1245_v22 = vrot.slane %v4195_v54, 1 }
 0x146   : > { %vm743_vm3 = vmand %vm4596_vm14, %vm5257_vm12  ;;  %v904_v42 = vor.u32 %v903_v61, %v899_v41  ;;  %v633_v13 = vmul.f32 1.4142135, %v603_v59  ;;  %v771_v56 = vsel %vm4611_vm8, %v631_v44, 0.0  ;;  %v2778_v59 = vpack.c.bf16 %v4162_v29, %v4156_v27  ;;  %v3720_v61 = vld [vmem:[%s5150_s4 + $0x88] sm:$0xff]  }
 0x147   : > { %v772_v53 = vsel %vm4596_vm14, %v632_v51, 0.0  ;;  %v1246_v43 = vrot.slane %v4203_v3, 1  ;;  %vm5178_vm7 = vcmask 1046528   ;;  %vm2780_vm0 = vmpackc.low %vm4144_vm15, %vm4170_vm6  ;;  %v1243_v28 = vrot.slane %v4187_v48, 1  ;;  %v3752_v3 = vld [vmem:[%s5150_s4 + $0x218] sm:$0xff]  }
 0x148   : > { %v4625_v33 = vpack.c.bf16 %v772_v53, %v771_v56  ;;  %v4632_v8 = vsel %vm5252_vm13, %v904_v42, %v908_v4  ;;  %v773_v14 = vsel %vm743_vm3, %v633_v13, 0.0  ;;  %vm5258_vm10 = vmmov %vm5252_vm13  ;;  %v4669_v42 = vpack.c.bf16 %v4243_v40, %v4241_v38  ;;  %v3722_v38 = vld [vmem:[%s5150_s4 + $0x90] sm:$0xff]  }
 0x149   : > { %3326 = vmatprep.mubr.bf16.mxu1 %v4632_v8  ;;  %3199 = vmatmul.mubr.bf16.gmra.mrb[16].mxu0 %v4632_v8  ;;  %v4638_v37 = vpack.c.bf16 %v773_v14, %v773_v14  ;;  %v4653_v54 = vsel %vm5178_vm7, %v1245_v22, %v1246_v43  ;;  %vm4659_vm12 = vmpackc.low %vm4215_vm4, %vm4231_vm11  ;;  %v1242_v13 = vrot.slane %v4185_v47, 1  ;;  %v4673_v56 = vpack.c.bf16 %v632_v51, %v631_v44  ;;  %v5278_v22 = vld [vmem:[#allocation15_spill] sm:$0xff]  ;;  %v3741_v14 = vld [vmem:[%s5150_s4 + $0x1e0] sm:$0xff]  }
 0x14a   : > { %v1633_v62 = vshll.u32 %v4625_v33, 16  ;;  %3218 = vmatprep.mubr.msk.bf16.mxu0 %vm2777_vm1, %v2778_v59  ;;  %v1631_v12 = vshrl.u32 %v4625_v33, 16  ;;  %v1248_v48 = vrot.slane %v4264_v1, 1  ;;  %v1249_v11 = vrot.slane %v4276_v5, 1  ;;  %vm4706_vm4 = vmpackc.low %vm4271_vm5, %vm4289_vm9  ;;  %v5273_v59 = vld [vmem:[#allocation12_spill] sm:$0xff] }
 0x14b   : > { %v1638_v4 = vshll.u32 %v4638_v37, 16  ;;  %v4687_v47 = vsel %vm5178_vm7, %v1242_v13, %v1243_v28  ;;  %v1251_v40 = vrot.slane %v4317_v45, 1  ;;  %v1252_v44 = vrot.slane %v4334_v63, 1 }
 0x14c   : > { %v1635_v30 = vrot.slane %v1633_v62, 1  ;;  %v4700_v51 = vsel %vm5178_vm7, %v1248_v48, %v1249_v11  ;;  %v4716_v45 = vpack.c.bf16 %v4296_v24, %v4294_v23  ;;  %vm5263_vm11 = vnez %v5206_v10  ;;  %v3721_v24 = vld [vmem:[%s5150_s4 + $0x190] sm:$0xff]   ;;  %v5277_v62 = vld [vmem:[#allocation14_spill] sm:$0xff]  ;;  %v3734_v48 = vld [vmem:[%s5150_s4 + $0xc0] sm:$0xff]  }
 0x14d   : > { %v1640_v29 = vrot.slane %v1638_v4, 1  ;;  %v4712_v5 = vsel %vm5178_vm7, %v1251_v40, %v1252_v44  ;;  %vm5264_vm3 = vnez %v5202_v49  ;;  %v4733_v23 = vpack.c.bf16 %v4373_v34, %v4362_v21  ;;  %v3726_v34 = vld [vmem:[%s5150_s4 + $0xa0] sm:$0xff]   ;;  %v3731_v11 = vld [vmem:[%s5150_s4 + $0x1b8] sm:$0xff]   ;;  %v3735_v40 = vld [vmem:[%s5150_s4 + $0x1c8] sm:$0xff]  }
 0x14e   : > { %v1636_v27 = vor.u32 %v1635_v30, %v1631_v12  ;;  %vm4722_vm1 = vmpackc.low %vm5264_vm3, %vm5263_vm11  ;;  %v1254_v49 = vrot.slane %v4395_v9, 1  ;;  %v1255_v63 = vrot.slane %v4397_v46, 1  ;;  %v1257_v10 = vrot.slane %v4462_v32, 1  ;;  %v3723_v9 = vld [vmem:[%s5150_s4 + $0x198] sm:$0xff]   ;;  %v3725_v12 = vld [vmem:[%s5150_s4 + $0x1a0] sm:$0xff]  }
 0x14f   : > { %v1258_v21 = vrot.slane %v4464_v16, 1  ;;  %vm5267_vm5 = vnez %v5218_v35  ;;  %vm5268_vm9 = vnez %v5215_v31  ;;  %v3728_v35 = vld [vmem:[%s5150_s4 + $0xa8] sm:$0xff]   ;;  %v5279_v30 = vld [vmem:[#allocation16_spill] sm:$0xff]  ;;  %v1261_v43 = vrot.slane %v4540_v0, 1  ;;  %v5296_v32 = vld [vmem:[#allocation17_spill] sm:$0xff] }
 0x150   : > { %v4650_v41 = vsel %vm5258_vm10, %v1636_v27, %v1640_v29  ;;  %v4755_v46 = vsel %vm5178_vm7, %v1254_v49, %v1255_v63  ;;  %vm4761_vm13 = vmpackc.low %vm5268_vm9, %vm5267_vm5  ;;  %vm5274_vm10 = vnez %v5273_v59  ;;  %v1260_v4 = vrot.slane %v5279_v30, 1  ;;  %v3727_v0 = vld [vmem:[%s5150_s4 + $0x1a8] sm:$0xff]   ;;  %v446_v44 = vld [vmem:[%s4070_s18 + $0xd8] sm:$0xff] }
 0x151   : > { %3327 = vmatmul.mubr.bf16.gmra.mrb[12].mxu1 %v4650_v41  ;;  %3219 = vmatmul.mubr.msk.bf16.vlgmr.msra.gmra.mrb[4].mxu0 %vm2780_vm0, %v4197_v55  ;;  %v4767_v16 = vsel %vm5178_vm7, %v1257_v10, %v1258_v21  ;;  %vm4777_vm11 = vmpackc.low %vm5274_vm10, %vm4494_vm2  ;;  %v1263_v27 = vrot.slane %v4587_v7, 1  ;;  %v1264_v29 = vrot.slane %v4589_v19, 1  ;;  %vm5280_vm2 = vnez %v5246_v57  ;;  %v3732_v57 = vld [vmem:[%s5150_s4 + $0xb8] sm:$0xff]   ;;  %v3742_v63 = vld [vmem:[%s5150_s4 + $0xe0] sm:$0xff]  }
 0x152   : > { %3346 = vmatprep.mubr.bf16.mxu1 %v4653_v54  ;;  %3222 = vmatprep.mubr.msk.bf16.mxu0 %vm4659_vm12, %v4669_v42  ;;  %v4809_v13 = vsel %vm5178_vm7, %v1260_v4, %v1261_v43  ;;  %vm5281_vm3 = vnez %v5239_v15  ;;  %v4825_v28 = vpack.c.bf16 %v4570_v18, %v4564_v26  ;;  %v3729_v15 = vld [vmem:[%s5150_s4 + $0x1b0] sm:$0xff]   ;;  %v1823_v26 = vrot.slane %v4625_v33, 1  ;;  %v3736_v33 = vld [vmem:[%s5150_s4 + $0xc8] sm:$0xff]   ;;  %v3739_v10 = vld [vmem:[%s5150_s4 + $0x1d8] sm:$0xff]  }
 0x153   : > { %3235 = vmatpush3.bf16.msra.mxu0 %v4507_v58  ;;  %v3719_v58 = vld [vmem:[%s5150_s4 + $0x188] sm:$0xff]   ;;  %vm4815_vm5 = vmpackc.low %vm5281_vm3, %vm5280_vm2  ;;  %v4821_v19 = vsel %vm5178_vm7, %v1263_v27, %v1264_v29  ;;  %v1824_v18 = vrot.slane %v4638_v37, 1  ;;  %v3733_v37 = vld [vmem:[%s5150_s4 + $0x1c0] sm:$0xff]  }
 0x154   : > { %3236 = vmatprep.subr.bf16.mxu0 %v3720_v61  ;;  %v5284_v21 = vld [vmem:[#allocation7_spill] sm:$0xff]  ;;  %v5285_v59 = vld [vmem:[#allocation6_spill] sm:$0xff]  ;;  %vm2870_vm2 = vmpackc.low %vm4596_vm14, %vm4611_vm8  ;;  %vm5299_vm14 = vcmask 1046528  }
 0x155   : > { %v3743_v30 = vld [vmem:[%s5150_s4 + $0x1e8] sm:$0xff]   ;;  %v3748_v27 = vld [vmem:[%s5150_s4 + $0xf8] sm:$0xff]  }
 0x156   : > { %v3756_v31 = vld [vmem:[%s5150_s4 + $0x238] sm:$0xff]  }
 0x157   : > { %3237 = vmatpush3.bf16.msra.mxu0 %v3720_v61  ;;  %v3730_v61 = vld [vmem:[%s5150_s4 + $0xb0] sm:$0xff]  }
 0x158   : > { %3238 = vmatprep.subr.bf16.mxu0 %v3722_v38 }
 0x159   : > { %3347 = vmatmul.mubr.bf16.vlgmr.msra.gmra.mrb[0].mxu1 %v4700_v51  ;;  %3223 = vmatmul.mubr.msk.bf16.gmra.mrb[8].mxu0 %vm4706_vm4, %v4716_v45 }
 0x15a   : > { %3363 = vmatpush3.bf16.msra.mxu1 %v4585_v6  ;;  %3350 = vmatprep.mubr.bf16.mxu1 %v4712_v5  ;;  %v5271_v6 = vld [vmem:[#allocation10_spill] sm:$0xff] }
 0x15b   : > { %3364 = vmatprep.subr.bf16.mxu1 %v3719_v58  ;;  %3226 = vmatprep.mubr.msk.bf16.mxu0 %vm4722_vm1, %v4733_v23  ;;  %v4771_v53 = vpack.c.bf16 %v5271_v6, %v4436_v50  ;;  %v4787_v50 = vpack.c.bf16 %v5278_v22, %v5277_v62  ;;  %v3744_v6 = vld [vmem:[%s5150_s4 + $0xe8] sm:$0xff]  }
 0x15c   : > { %3239 = vmatpush3.bf16.msra.mxu0 %v3722_v38  ;;  %v4847_v38 = vsel %vm5178_vm7, %v1823_v26, %v1824_v18  ;;  %v3749_v18 = vld [vmem:[%s5150_s4 + $0x200] sm:$0xff]  }
 0x15d   : > { %3240 = vmatprep.subr.bf16.mxu0 %v3724_v17 }
 0x15e   : > { %3365 = vmatpush3.bf16.msra.mxu1 %v3719_v58  ;;  %v447_v58 = vld [vmem:[%s4070_s18 + $0xe0] sm:$0xff] }
 0x15f   : > { %3366 = vmatprep.subr.bf16.mxu1 %v3721_v24  ;;  %v481_v49 = vmul.f32 %v4088_v52, %v447_v58  ;;  %v5297_v58 = vld [vmem:[#allocation18_spill] sm:$0xff] }
 0x160   : > { %3241 = vmatpush3.bf16.msra.mxu0 %v3724_v17  ;;  %v3737_v17 = vld [vmem:[%s5150_s4 + $0x1d0] sm:$0xff]  }
 0x161   : > { %3351 = vmatmul.mubr.bf16.gmra.mrb[4].mxu1 %v4755_v46  ;;  %3242 = vmatprep.subr.bf16.mxu0 %v3726_v34 }
 0x162   : > { %3367 = vmatpush3.bf16.msra.mxu1 %v3721_v24  ;;  %3354 = vmatprep.mubr.bf16.mxu1 %v4767_v16  ;;  %v480_v24 = vmul.f32 %v4088_v52, %v446_v44  ;;  %v3753_v44 = vld [vmem:[%s5150_s4 + $0x220] sm:$0xff]  }
 0x163   : > { %3368 = vmatprep.subr.bf16.mxu1 %v3723_v9  ;;  %3227 = vmatmul.mubr.msk.bf16.gmra.mrb[12].mxu0 %vm4761_vm13, %v4771_v53 }
 0x164   : > { %3230 = vmatprep.mubr.msk.bf16.mxu0 %vm4777_vm11, %v4787_v50  ;;  %3243 = vmatpush3.bf16.msra.mxu0 %v3726_v34  ;;  %v514_v34 = vadd.f32 %v5284_v21, %v480_v24  ;;  %v3755_v24 = vld [vmem:[%s5150_s4 + $0x230] sm:$0xff]  }
 0x165   : > { %3244 = vmatprep.subr.bf16.mxu0 %v3728_v35 }
 0x166   : > { %3369 = vmatpush3.bf16.msra.mxu1 %v3723_v9  ;;  %v515_v9 = vadd.f32 %v5284_v21, %v481_v49  ;;  %v574_v62 = vmul.f32 0.2, %v514_v34  ;;  %vm544_vm9 = vcmp.ge.f32.partialorder %v514_v34, 0.0 }
 0x167   : > { %3370 = vmatprep.subr.bf16.mxu1 %v3725_v12 }
 0x168   : > { %3245 = vmatpush3.bf16.msra.mxu0 %v3728_v35  ;;  %v646_v35 = vadd.s32 9, %v5285_v59  ;;  %v575_v22 = vmul.f32 0.2, %v515_v9  ;;  %vm545_vm10 = vcmp.ge.f32.partialorder %v515_v9, 0.0  ;;  %v604_v4 = vsel %vm544_vm9, %v514_v34, %v574_v62 }
 0x169   : > { %3355 = vmatmul.mubr.bf16.gmra.mrb[8].mxu1 %v4809_v13  ;;  %3246 = vmatprep.subr.bf16.mxu0 %v3730_v61 }
 0x16a   : > { %3371 = vmatpush3.bf16.msra.mxu1 %v3725_v12  ;;  %3358 = vmatprep.mubr.bf16.mxu1 %v4821_v19  ;;  %v3746_v12 = vld [vmem:[%s5150_s4 + $0xf0] sm:$0xff]   ;;  %vm660_vm3 = vcmp.ge.s32.totalorder %v646_v35, 1  ;;  %vm670_vm7 = vcmp.le.s32.totalorder %v646_v35, 16  ;;  %v605_v43 = vsel %vm545_vm10, %v515_v9, %v575_v22 }
 0x16b   : > { %3372 = vmatprep.subr.bf16.mxu1 %v3727_v0  ;;  %3231 = vmatmul.mubr.msk.bf16.gmra.mrb[16].mxu0 %vm4815_vm5, %v4825_v28  ;;  %vm4930_vm9 = vmand %vm660_vm3, %vm670_vm7 }
 0x16c   : > { %3247 = vmatpush3.bf16.msra.mxu0 %v3730_v61  ;;  %3250 = vmatprep.mubr.bf16.mxu0 %v4687_v47  ;;  %v3738_v47 = vld [vmem:[%s5150_s4 + $0xd0] sm:$0xff]  }
 0x16d   : > { %3248 = vmatprep.subr.bf16.mxu0 %v3732_v57  ;;  %v3745_v61 = vld [vmem:[%s5150_s4 + $0x1f0] sm:$0xff]  }
 0x16e   : > { %3373 = vmatpush3.bf16.msra.mxu1 %v3727_v0  ;;  %v634_v0 = vmul.f32 1.4142135, %v604_v4 }
 0x16f   : > { %3374 = vmatprep.subr.bf16.mxu1 %v3729_v15 }
 0x170   : > { %3249 = vmatpush3.bf16.msra.mxu0 %v3732_v57  ;;  %v635_v57 = vmul.f32 1.4142135, %v605_v43 }
 0x171   : > { %3359 = vmatmul.mubr.bf16.gmra.mrb[12].mxu1 %v4847_v38  ;;  %3266 = vmatprep.subr.bf16.mxu0 %v3734_v48 }
 0x172   : > { %3375 = vmatpush3.bf16.msra.mxu1 %v3729_v15  ;;  %3378 = vmatprep.mubr.msk.bf16.mxu1 %vm4659_vm12, %v4669_v42  ;;  %v5288_v15 = vld [vmem:[#allocation5_spill] sm:$0xff]  ;;  %v2967_v20 = vpack.c.bf16 %v635_v57, %v634_v0 }
 0x173   : > { %3376 = vmatprep.subr.bf16.mxu1 %v3731_v11  ;;  %3251 = vmatmul.mubr.bf16.vlgmr.msra.gmra.mrb[4].mxu0 %v4653_v54  ;;  %v3740_v54 = vld [vmem:[%s5150_s4 + $0xd8] sm:$0xff]   ;;  %vm5289_vm7 = vcmp.ge.s32.totalorder %v5288_v15, 1 }
 0x174   : > { %3254 = vmatprep.mubr.bf16.mxu0 %v4700_v51  ;;  %3267 = vmatpush3.bf16.msra.mxu0 %v3734_v48  ;;  %vm4948_vm10 = vmand %vm4930_vm9, %vm5289_vm7  ;;  %v448_v48 = vld [vmem:[%s4070_s18 + $0xe8] sm:$0x3]  ;;  %s5084_s18 = scalar_lea.hbm %s5152_s6, %s3022_s24 }
 0x175   : > { %3268 = vmatprep.subr.bf16.mxu0 %v3736_v33  ;;  %vm2966_vm15 = vmpackc.low %vm4930_vm9, %vm4948_vm10 }
 0x176   : > { %3377 = vmatpush3.bf16.msra.mxu1 %v3731_v11  ;;  %v3750_v11 = vld [vmem:[%s5150_s4 + $0x208] sm:$0xff]  }
 0x177   : > { %3394 = vmatprep.subr.bf16.mxu1 %v3733_v37 }
 0x178   : > { %3269 = vmatpush3.bf16.msra.mxu0 %v3736_v33  ;;  %v5292_v33 = vld [vmem:[#allocation8_spill] sm:$0xff] }
 0x179   : > { %3379 = vmatmul.mubr.msk.bf16.vlgmr.msra.gmra.mrb[0].mxu1 %vm4706_vm4, %v4716_v45  ;;  %3270 = vmatprep.subr.bf16.mxu0 %v3738_v47 }
 0x17a   : > { %3395 = vmatpush3.bf16.msra.mxu1 %v3733_v37  ;;  %3382 = vmatprep.mubr.msk.bf16.mxu1 %vm4722_vm1, %v4733_v23  ;;  %v3751_v37 = vld [vmem:[%s5150_s4 + $0x210] sm:$0xff]  }
 0x17b   : > { %3396 = vmatprep.subr.bf16.mxu1 %v3735_v40  ;;  %3255 = vmatmul.mubr.bf16.gmra.mrb[8].mxu0 %v4712_v5 }
 0x17c   : > { %3258 = vmatprep.mubr.bf16.mxu0 %v4755_v46  ;;  %3271 = vmatpush3.bf16.msra.mxu0 %v3738_v47 }
 0x17d   : > { %3272 = vmatprep.subr.bf16.mxu0 %v3740_v54 }
 0x17e   : > { %3397 = vmatpush3.bf16.msra.mxu1 %v3735_v40  ;;  %v5293_v40 = vld [vmem:[#allocation9_spill] sm:$0xff] }
 0x17f   : > { %3398 = vmatprep.subr.bf16.mxu1 %v3737_v17 }
 0x180   : > { %3273 = vmatpush3.bf16.msra.mxu0 %v3740_v54  ;;  %v775_v54 = vsel %vm4930_vm9, %v635_v57, 0.0  ;;  %v5044_v57 = vld [vmem:[%s5151_s5] ss:$0 sm:$0xff] }
 0x181   : > { %3383 = vmatmul.mubr.msk.bf16.gmra.mrb[4].mxu1 %vm4761_vm13, %v4771_v53  ;;  %3274 = vmatprep.subr.bf16.mxu0 %v3742_v63 }
 0x182   : > { %3399 = vmatpush3.bf16.msra.mxu1 %v3737_v17  ;;  %3386 = vmatprep.mubr.msk.bf16.mxu1 %vm4777_vm11, %v4787_v50 }
 0x183   : > { %3400 = vmatprep.subr.bf16.mxu1 %v3739_v10  ;;  %3259 = vmatmul.mubr.bf16.gmra.mrb[12].mxu0 %v4767_v16 }
 0x184   : > { %3262 = vmatprep.mubr.bf16.mxu0 %v4809_v13  ;;  %3275 = vmatpush3.bf16.msra.mxu0 %v3742_v63 }
 0x185   : > { %3276 = vmatprep.subr.bf16.mxu0 %v3744_v6 }
 0x186   : > { %3401 = vmatpush3.bf16.msra.mxu1 %v3739_v10 }
 0x187   : > { %3402 = vmatprep.subr.bf16.mxu1 %v3741_v14 }
 0x188   : > { %3277 = vmatpush3.bf16.msra.mxu0 %v3744_v6 }
 0x189   : > { %3387 = vmatmul.mubr.msk.bf16.gmra.mrb[8].mxu1 %vm4815_vm5, %v4825_v28  ;;  %3278 = vmatprep.subr.bf16.mxu0 %v3746_v12 }
 0x18a   : > { %3403 = vmatpush3.bf16.msra.mxu1 %v3741_v14  ;;  %3390 = vmatprep.mubr.msk.bf16.mxu1 %vm2870_vm2, %v4673_v56 }
 0x18b   : > { %3404 = vmatprep.subr.bf16.mxu1 %v3743_v30  ;;  %3263 = vmatmul.mubr.bf16.gmra.mrb[16].mxu0 %v4821_v19 }
 0x18c   : > { %3279 = vmatpush3.bf16.msra.mxu0 %v3746_v12  ;;  %3282 = vmatprep.mubr.msk.bf16.mxu0 %vm2780_vm0, %v4197_v55  ;;  %v482_v55 = vmul.f32 %v4088_v52, %v448_v48  ;;  %vm5295_vm0 = vcmp.le.s32.totalorder %v4073_v39, 16 }
 0x18d   : > { %3280 = vmatprep.subr.bf16.mxu0 %v3748_v27 }
 0x18e   : > { %3405 = vmatpush3.bf16.msra.mxu1 %v3743_v30  ;;  %v516_v52 = vadd.f32 %v5284_v21, %v482_v55 }
 0x18f   : > { %3406 = vmatprep.subr.bf16.mxu1 %v3745_v61 }
 0x190   : > { %3281 = vmatpush3.bf16.msra.mxu0 %v3748_v27  ;;  %v576_v47 = vmul.f32 0.2, %v516_v52  ;;  %vm546_vm6 = vcmp.ge.f32.partialorder %v516_v52, 0.0 }
 0x191   : > { %3391 = vmatmul.mubr.msk.bf16.gmra.mrb[12].mxu1 %vm2966_vm15, %v2967_v20  ;;  %3426 = vmatprep.subr.bf16.mxu0 %v3749_v18 }
 0x192   : > { %3407 = vmatpush3.bf16.msra.mxu1 %v3745_v61  ;;  %3410 = vmatprep.mubr.bf16.mxu1 %v5292_v33  ;;  %v606_v1 = vsel %vm546_vm6, %v516_v52, %v576_v47 }
 0x193   : > { %3408 = vmatprep.subr.bf16.mxu1 %v3747_v36  ;;  %3283 = vmatmul.mubr.msk.bf16.vlgmr.msra.gmra.mrb[4].mxu0 %vm4659_vm12, %v4669_v42  ;;  %v5294_v42 = vld [vmem:[#allocation11_spill] sm:$0xff]  ;;  %v636_v2 = vmul.f32 1.4142135, %v606_v1  ;;  %vm746_vm12 = vmand %vm4930_vm9, %vm5295_vm0 }
 0x194   : > { %3286 = vmatprep.mubr.msk.bf16.mxu0 %vm4706_vm4, %v4716_v45  ;;  %3427 = vmatpush3.bf16.msra.mxu0 %v3749_v18  ;;  %v774_v45 = vsel %vm4948_vm10, %v634_v0, 0.0  ;;  %vm5298_vm4 = vsmask.f32 7424 }
 0x195   : > { %3428 = vmatprep.subr.bf16.mxu0 %v3750_v11  ;;  %v776_v17 = vsel %vm746_vm12, %v636_v2, 0.0 }
 0x196   : > { %3409 = vmatpush3.bf16.msra.mxu1 %v3747_v36  ;;  %v796_v49 = vpack.c.bf16 %v776_v17, %v776_v17 }
 0x197   : > { %3466 = vmatprep.subr.bf16.mxu1 %v3749_v18 }
 0x198   : > { %3429 = vmatpush3.bf16.msra.mxu0 %v3750_v11  ;;  %v2191_v7 = vshll.u32 %v796_v49, 16  ;;  %v2377_v60 = vrot.slane %v796_v49, 1 }
 0x199   : > { %3411 = vmatmul.mubr.bf16.vlgmr.msra.gmra.mrb[0].mxu1 %v5293_v40  ;;  %3430 = vmatprep.subr.bf16.mxu0 %v3751_v37 }
 0x19a   : > { %3474 = vmatpush3.bf16.msra.mxu1 %v3749_v18  ;;  %3414 = vmatprep.mubr.bf16.mxu1 %v5294_v42 }
 0x19b   : > { %3467 = vmatprep.subr.bf16.mxu1 %v3750_v11  ;;  %3287 = vmatmul.mubr.msk.bf16.gmra.mrb[8].mxu0 %vm4722_vm1, %v4733_v23  ;;  %v795_v23 = vpack.c.bf16 %v775_v54, %v774_v45 }
 0x19c   : > { %3290 = vmatprep.mubr.msk.bf16.mxu0 %vm4761_vm13, %v4771_v53  ;;  %3431 = vmatpush3.bf16.msra.mxu0 %v3751_v37  ;;  %v3754_v53 = vld [vmem:[%s5150_s4 + $0x228] sm:$0xff]  }
 0x19d   : > { %3432 = vmatprep.subr.bf16.mxu0 %v3752_v3  ;;  %v2186_v39 = vshll.u32 %v795_v23, 16  ;;  %v2376_v25 = vrot.slane %v795_v23, 1 }
 0x19e   : > { %3475 = vmatpush3.bf16.msra.mxu1 %v3750_v11 }
 0x19f   : > { %3468 = vmatprep.subr.bf16.mxu1 %v3751_v37  ;;  %v2188_v63 = vrot.slane %v2186_v39, 1 }
 0x1a0   : > { %3433 = vmatpush3.bf16.msra.mxu0 %v3752_v3 }
 0x1a1   : > { %3415 = vmatmul.mubr.bf16.gmra.mrb[4].mxu1 %v5296_v32  ;;  %3434 = vmatprep.subr.bf16.mxu0 %v3753_v44 }
 0x1a2   : > { %3476 = vmatpush3.bf16.msra.mxu1 %v3751_v37  ;;  %3418 = vmatprep.mubr.bf16.mxu1 %v5297_v58 }
 0x1a3   : > { %3469 = vmatprep.subr.bf16.mxu1 %v3752_v3  ;;  %3291 = vmatmul.mubr.msk.bf16.gmra.mrb[12].mxu0 %vm4777_vm11, %v4787_v50  ;;  %v2184_v50 = vshrl.u32 %v795_v23, 16 }
 0x1a4   : > { %3294 = vmatprep.mubr.msk.bf16.mxu0 %vm4815_vm5, %v4825_v28  ;;  %3435 = vmatpush3.bf16.msra.mxu0 %v3753_v44 }
 0x1a5   : > { %3436 = vmatprep.subr.bf16.mxu0 %v3754_v53  ;;  %v2189_v28 = vor.u32 %v2188_v63, %v2184_v50 }
 0x1a6   : > { %3477 = vmatpush3.bf16.msra.mxu1 %v3752_v3 }
 0x1a7   : > { %3470 = vmatprep.subr.bf16.mxu1 %v3753_v44 }
 0x1a8   : > { %3437 = vmatpush3.bf16.msra.mxu0 %v3754_v53 }
 0x1a9   : > { %3419 = vmatmul.mubr.bf16.gmra.mrb[8].mxu1 %v4632_v8  ;;  %3438 = vmatprep.subr.bf16.mxu0 %v3755_v24  ;;  %v2193_v8 = vrot.slane %v2191_v7, 1 }
 0x1aa   : > { %3478 = vmatpush3.bf16.msra.mxu1 %v3753_v44  ;;  %3422 = vmatprep.mubr.bf16.mxu1 %v4650_v41 }
 0x1ab   : > { %3471 = vmatprep.subr.bf16.mxu1 %v3754_v53  ;;  %3295 = vmatmul.mubr.msk.bf16.gmra.mrb[16].mxu0 %vm2870_vm2, %v4673_v56  ;;  %v2194_v41 = vsel %vm5298_vm4, %v2189_v28, %v2193_v8  ;;  %v2378_v56 = vsel %vm5299_vm14, %v2376_v25, %v2377_v60 }
 0x1ac   : > { %3439 = vmatpush3.bf16.msra.mxu0 %v3755_v24  ;;  %3442 = vmatprep.mubr.bf16.mxu0 %v4700_v51 }
 0x1ad   : > { %3440 = vmatprep.subr.bf16.mxu0 %v3756_v31 }
 0x1ae   : > { %3479 = vmatpush3.bf16.msra.mxu1 %v3754_v53 }
 0x1af   : > { %3472 = vmatprep.subr.bf16.mxu1 %v3755_v24 }
 0x1b0   : > { %3441 = vmatpush3.bf16.msra.mxu0 %v3756_v31 }
 0x1b1   : > { %3423 = vmatmul.mubr.bf16.gmra.mrb[12].mxu1 %v2194_v41 }
 0x1b2   : > { %3480 = vmatpush3.bf16.msra.mxu1 %v3755_v24  ;;  %3446 = vmatprep.mubr.bf16.mxu1 %v4755_v46 }
 0x1b3   : > { %3473 = vmatprep.subr.bf16.mxu1 %v3756_v31  ;;  %3443 = vmatmul.mubr.bf16.vlgmr.msra.gmra.mrb[20].mxu0 %v4712_v5 }
 0x1b6   : > { %3481 = vmatpush3.bf16.msra.mxu1 %v3756_v31 }
 0x1b9   : > { %3447 = vmatmul.mubr.bf16.vlgmr.msra.gmra.mrb[4].mxu1 %v4767_v16 }
 0x1ba   : > { %3450 = vmatprep.mubr.bf16.mxu1 %v4809_v13 }
 0x1c1   : > { %3451 = vmatmul.mubr.bf16.gmra.mrb[8].mxu1 %v4821_v19 }
 0x1c2   : > { %3454 = vmatprep.mubr.bf16.mxu1 %v4847_v38 }
 0x1c9   : > { %3455 = vmatmul.mubr.bf16.gmra.mrb[12].mxu1 %v2378_v56 }
 0x266   : > { %v3284_v51 = vpop.f32.mrb[4].mxu0 }
 0x267   : > { %v1551_v10 = vpop.f32.mrb[5].mxu0 }
 0x268   : > { %v3285_v46 = vpop.f32.mrb[6].mxu0 }
 0x269   : > { %v1554_v21 = vpop.f32.mrb[7].mxu0 }
 0x26c   : > { %v3412_v34 = vpop.f32.mrb[0].mxu1 }
 0x26d   : > { %v3482_v5 = vadd.f32 %v3412_v34, %v3284_v51  ;;  %v2295_v9 = vpop.f32.mrb[1].mxu1 }
 0x26e   : > { %v3484_v6 = vadd.f32 %v2295_v9, %v1551_v10  ;;  %v3413_v16 = vpop.f32.mrb[2].mxu1  ;;  %v3288_v13 = vpop.f32.mrb[8].mxu0 }
 0x26f   : > { %v3486_v19 = vadd.f32 %v3413_v16, %v3285_v46  ;;  %v2298_v14 = vpop.f32.mrb[3].mxu1  ;;  %v1567_v38 = vpop.f32.mrb[9].mxu0 }
 0x270   : > { %v3488_v59 = vadd.f32 %v2298_v14, %v1554_v21  ;;  %v3289_v35 = vpop.f32.mrb[10].mxu0 }
 0x271   : > { %v1570_v62 = vpop.f32.mrb[11].mxu0 }
 0x276   : > { %v3292_v22 = vpop.f32.mrb[12].mxu0 }
 0x277   : > { %v1583_v12 = vpop.f32.mrb[13].mxu0 }
 0x278   : > { %v3293_v30 = vpop.f32.mrb[14].mxu0 }
 0x279   : > { %v1586_v4 = vpop.f32.mrb[15].mxu0 }
 0x27e   : > { %v3296_v43 = vpop.f32.mrb[16].mxu0 }
 0x27f   : > { %v1599_v27 = vpop.f32.mrb[17].mxu0 }
 0x280   : > { %v5034_v29 = vpop.f32.mrb[18].mxu0 }
 0x281   : > { %v5036_v61 = vpop.f32.mrb[19].mxu0 }
 0x286   : > { %v3444_v0 = vpop.f32.mrb[20].mxu0 }
 0x287   : > { %v3483_v15 = vadd.f32 %v3482_v5, %v3444_v0  ;;  %v2479_v26 = vpop.f32.mrb[21].mxu0 }
 0x288   : > { %v3485_v18 = vadd.f32 %v3484_v6, %v2479_v26  ;;  %v3445_v48 = vpop.f32.mrb[22].mxu0 }
 0x289   : > { %v2567_v20 = vadd.f32 %v3483_v15, %v5044_v57  ;;  %v3487_v36 = vadd.f32 %v3486_v19, %v3445_v48  ;;  %v2482_v55 = vpop.f32.mrb[23].mxu0 }
 0x28a   : > { %v2565_v11 = vadd.f32 %v3485_v18, %v5044_v57  ;;  %v3489_v33 = vadd.f32 %v3488_v59, %v2482_v55 }
 0x28b   : > { %2583 = vst [vmem:[%s5048_s29 + $0x10] sm:$0xff] %v2567_v20  ;;  %v2568_v52 = vadd.f32 %v3487_v36, %v5044_v57 }
 0x28c   : > { %v3448_v37 = vpop.f32.mrb[4].mxu1  ;;  %2581 = vst [vmem:[%s5048_s29] sm:$0xff] %v2565_v11  ;;  %v2566_v47 = vadd.f32 %v3489_v33, %v5044_v57 }
 0x28d   : > { %v3490_v40 = vadd.f32 %v3448_v37, %v3288_v13  ;;  %v2495_v3 = vpop.f32.mrb[5].mxu1  ;;  %2584 = vst [vmem:[%s5048_s29 + $0x18] sm:$0xff] %v2568_v52 }
 0x28e   : > { %v3491_v42 = vadd.f32 %v2495_v3, %v1567_v38  ;;  %v3449_v1 = vpop.f32.mrb[6].mxu1  ;;  %2582 = vst [vmem:[%s5048_s29 + $0x8] sm:$0xff] %v2566_v47 }
 0x28f   : > { %v2571_v45 = vadd.f32 %v3490_v40, %v5044_v57  ;;  %v3492_v54 = vadd.f32 %v3449_v1, %v3289_v35  ;;  %v2498_v44 = vpop.f32.mrb[7].mxu1 }
 0x290   : > { %v2569_v2 = vadd.f32 %v3491_v42, %v5044_v57  ;;  %v3493_v23 = vadd.f32 %v2498_v44, %v1570_v62 }
 0x291   : > { %2587 = vst [vmem:[%s5048_s29 + $0x30] sm:$0xff] %v2571_v45  ;;  %v2572_v32 = vadd.f32 %v3492_v54, %v5044_v57 }
 0x292   : > { %2585 = vst [vmem:[%s5048_s29 + $0x20] sm:$0xff] %v2569_v2  ;;  %v2570_v53 = vadd.f32 %v3493_v23, %v5044_v57 }
 0x293   : > { %2588 = vst [vmem:[%s5048_s29 + $0x38] sm:$0xff] %v2572_v32 }
 0x294   : > { %2586 = vst [vmem:[%s5048_s29 + $0x28] sm:$0xff] %v2570_v53  ;;  %v3452_v58 = vpop.f32.mrb[8].mxu1 }
 0x295   : > { %v3494_v17 = vadd.f32 %v3452_v58, %v3292_v22  ;;  %v2511_v39 = vpop.f32.mrb[9].mxu1 }
 0x296   : > { %v3495_v24 = vadd.f32 %v2511_v39, %v1583_v12  ;;  %v3453_v49 = vpop.f32.mrb[10].mxu1 }
 0x297   : > { %v2575_v63 = vadd.f32 %v3494_v17, %v5044_v57  ;;  %v3496_v31 = vadd.f32 %v3453_v49, %v3293_v30  ;;  %v2514_v50 = vpop.f32.mrb[11].mxu1 }
 0x298   : > { %v2573_v7 = vadd.f32 %v3495_v24, %v5044_v57  ;;  %v3497_v28 = vadd.f32 %v2514_v50, %v1586_v4 }
 0x299   : > { %2591 = vst [vmem:[%s5048_s29 + $0x50] sm:$0xff] %v2575_v63  ;;  %v2576_v8 = vadd.f32 %v3496_v31, %v5044_v57 }
 0x29a   : > { %2589 = vst [vmem:[%s5048_s29 + $0x40] sm:$0xff] %v2573_v7  ;;  %v2574_v41 = vadd.f32 %v3497_v28, %v5044_v57 }
 0x29b   : > { %2592 = vst [vmem:[%s5048_s29 + $0x58] sm:$0xff] %v2576_v8 }
 0x29c   : > { %2590 = vst [vmem:[%s5048_s29 + $0x48] sm:$0xff] %v2574_v41  ;;  %v3456_v25 = vpop.f32.mrb[12].mxu1 }
 0x29d   : > { %v3498_v60 = vadd.f32 %v3456_v25, %v3296_v43  ;;  %v2527_v56 = vpop.f32.mrb[13].mxu1 }
 0x29e   : > { %v3499_v51 = vadd.f32 %v2527_v56, %v1599_v27  ;;  %v3457_v10 = vpop.f32.mrb[14].mxu1 }
 0x29f   : > { %v2579_v46 = vadd.f32 %v3498_v60, %v5044_v57  ;;  %v3500_v21 = vadd.f32 %v3457_v10, %v5034_v29  ;;  %v2530_v34 = vpop.f32.mrb[15].mxu1 }
 0x2a0   : > { %v2577_v5 = vadd.f32 %v3499_v51, %v5044_v57  ;;  %v3501_v9 = vadd.f32 %v2530_v34, %v5036_v61 }
 0x2a1   : > { %2595 = vst [vmem:[%s5048_s29 + $0x70] sm:$0xff] %v2579_v46  ;;  %v2580_v6 = vadd.f32 %v3500_v21, %v5044_v57 }
 0x2a2   : > { %2593 = vst [vmem:[%s5048_s29 + $0x60] sm:$0xff] %v2577_v5  ;;  %v2578_v16 = vadd.f32 %v3501_v9, %v5044_v57 }
 0x2a3   : > { %2596 = vst [vmem:[%s5048_s29 + $0x78] sm:$0xff] %v2580_v6 }
 0x2a4   : > { %2594 = vst [vmem:[%s5048_s29 + $0x68] sm:$0xff] %v2578_v16 }
 0x2a5   : > { %3770 = shalt.err (!%p3767_p6)
}
 0x2a6   : > { %s3771_s13 = scalar_lea.hbm %s5084_s18, 2048  ;;  %s3775_s24 = scalar_lea.hbm %s5152_s6, 8192 }
 0x2a7   : > { %p3772_p7 = scmp.ne.s32.totalorder %s5084_s18, %s3771_s13  ;;  %p3776_p11 = scmp.lt.u32.totalorder %s5084_s18, %s5152_s6 }
 0x2a8   : > { %p3777_p12 = scmp.lt.u32.totalorder %s3775_s24, %s3771_s13  ;;  %p3779_p0 = scmp.lt.u32.totalorder %s3771_s13, %s5084_s18 }
 0x2a9   : > { %p3773_p9 = pnand %p3772_p7, %p3943_p3 }
 0x2aa   : > { %p3778_p13 = por %p3777_p12, %p3776_p11 }
 0x2ab   : > { %p3774_p10 = pneg %p3773_p9 }
 0x2ac   : > { %p3780_p1 = por %p3779_p0, %p3778_p13 }
 0x2ae   : > { %p3781_p2 = pnand %p3780_p1, %p3774_p10 }
 0x2b0   : > { %3784 = shalt.err (!%p3781_p2)
}
 0x2b1   : > { %s3855_s16 = smov 128   ;;  %s3856_s17 = smov 8  }
 0x2b2   : > { %3611 = dma.vmem_to_hbm [thread:$0]  (%p3943_p3), %s5086_s25, 2048, %s5084_s18, %s5094_s14, %s3855_s16, %s3855_s16, %s3856_s17  }
 0x2b3 PF: > { %p3617_p4 = scmp.ge.s32.totalorder %s3851_s28, 2  ;;  %s2630_s19 = sand.u32 1, %s3823_s21  }
 0x2b4   : > { %s2631_s20 = scalar_lea.sflag [#allocation3], %s2630_s19 }
 0x2b5   : > { %p3614_p5 = pnand %p3617_p4, %p3952_p8 }
 0x2b7   : > { %3818 = dma.done.wait (!%p3614_p5), %s2631_s20, 2048  }
 0x2b8   : > { %3820 = vsyncadd (!%p3614_p5), %s2631_s20, 4294965248  ;;  %s19_s28 = sadd.s32 1, %s3851_s28   ;;  %s5300_s21 = smov %s3827_s22 }
 0x2b9   : > { %p16_p6 = scmp.ge.s32.totalorder %s19_s28, 6   ;;  %s5301_s22 = smov %s3831_s23 }
 0x2ba   : > { %s5302_s23 = smov %s3961_s15  ;;  %s5303_s24 = smov %s3843_s26 }
 0x2bb   : > { %s5304_s25 = smov %s3847_s27  ;;  %s5305_s26 = smov %s5308_s7 }
 0x2bc   : > { %s5306_s27 = smov %s5312_s8  ;;  %18 = sbr.rel (!%p16_p6) target bundleno = 5 (0x5), region = 97 }
 0x2c3   :  { %2636 = vsyncpa [#allocation3], 1 }
 0x2c4   :  { %2638 = vsyncpa [#allocation3 + $0x1], 1 }

</bundles_post_ra>
